<compile_context>
chip_gen: v7x
topology: tpu7x:2x2x1
jax: 0.10.0
libtpu: 0.0.40
codegen_flags: <defaults>
</compile_context>

<pallas_src>
import math

import jax
import jax.numpy as jnp
from jax import lax
from jax.experimental import pallas as pl
from jax.experimental.pallas import tpu as pltpu

LRELU_SLOPE = 0.1


# -----------------------------------------------------------------------------
# Pallas kernels (operate on lane-packed (rows, lanes) tiles)
# -----------------------------------------------------------------------------
def _branch_kernel(mag_ref, pha_ref,
                   wa1_ref, ba1_ref, wa2_ref, ba2_ref,
                   wp1_ref, bp1_ref, wp2_ref, bp2_ref,
                   real_ref, imag_ref):
    """amp_fuse / pha_fuse (conv1x1 -> LeakyReLU(0.1) -> conv1x1) + polar->cartesian.

    Weights are bf16 block-diagonal (pixel-folded); accumulation / bias /
    activation / cos / sin stay f32.
    """
    def conv_stack(x, w1, b1, w2, b2):
        h = jnp.dot(x.astype(jnp.bfloat16), w1,
                    preferred_element_type=jnp.float32) + b1
        h = jnp.where(h >= 0, h, LRELU_SLOPE * h)          # LeakyReLU(0.1), f32
        return jnp.dot(h.astype(jnp.bfloat16), w2,
                       preferred_element_type=jnp.float32) + b2

    Mag = conv_stack(mag_ref[...], wa1_ref[...], ba1_ref[...],
                     wa2_ref[...], ba2_ref[...])
    Pha = conv_stack(pha_ref[...], wp1_ref[...], bp1_ref[...],
                     wp2_ref[...], bp2_ref[...])
    real_ref[...] = Mag * jnp.cos(Pha)
    imag_ref[...] = Mag * jnp.sin(Pha)


def _post_fuse_kernel(crop_ref, x2_ref,
                      wpost_ref, bpost_ref, wfuse_ref, bfuse_ref,
                      out_ref):
    """post conv1x1 on the frequency branch, add bilinear branch, fuse conv1x1."""
    x3 = jnp.dot(crop_ref[...].astype(jnp.bfloat16), wpost_ref[...],
                 preferred_element_type=jnp.float32) + bpost_ref[...]
    xm = x2_ref[...] + x3
    out_ref[...] = jnp.dot(xm.astype(jnp.bfloat16), wfuse_ref[...],
                           preferred_element_type=jnp.float32) + bfuse_ref[...]


# -----------------------------------------------------------------------------
# Tiling / packing helpers
# -----------------------------------------------------------------------------
def _fold_factor(p, c):
    """Smallest pixel-fold factor that makes the lane width a multiple of 128."""
    if c % 128 == 0:
        return 1
    f = 128 // math.gcd(c, 128)
    if p % f == 0:
        return f
    return 1  # lane-sparse fallback (still correct)


def _pick_row_tile(rows, n_row_bufs, lane_width, elem_bytes=4,
                   vmem_budget=24 * 1024 * 1024):
    """Largest row tile within a conservative VMEM budget (double-buffered),
    preferring a grid of >= 2 steps so v7x can use both TensorCores."""
    cap = max(8, vmem_budget // (n_row_bufs * 2 * lane_width * elem_bytes))
    candidates = (8192, 4096, 2048, 1024, 512, 256, 128, 64, 32, 16, 8)
    for t in candidates:
        if t <= cap and rows % t == 0 and rows // t >= 2:
            return t
    for t in candidates:
        if t <= cap and rows % t == 0:
            return t
    return rows


def _fold_params(wT, b, fold):
    """bf16 block-diagonal weight (fold copies on the diagonal) + tiled f32 bias."""
    w = wT.astype(jnp.bfloat16)
    if fold > 1:
        w = jnp.kron(jnp.eye(fold, dtype=w.dtype), w)
        b = jnp.tile(b, (1, fold))
    return w, b.astype(jnp.float32)


_COMPILER_PARAMS = pltpu.CompilerParams(
    dimension_semantics=("parallel",),
    vmem_limit_bytes=32 * 1024 * 1024,
)


# -----------------------------------------------------------------------------
# pallas_call wrappers
# -----------------------------------------------------------------------------
def _run_branch(mag2d, pha2d, params):
    P, C = mag2d.shape
    fold = _fold_factor(P, C)
    L, R = C * fold, P // fold
    mag_f = mag2d.reshape(R, L)
    pha_f = pha2d.reshape(R, L)

    (wa1, ba1), (wa2, ba2) = params["amp1"], params["amp2"]
    (wp1, bp1), (wp2, bp2) = params["pha1"], params["pha2"]
    wa1, ba1 = _fold_params(wa1, ba1, fold)
    wa2, ba2 = _fold_params(wa2, ba2, fold)
    wp1, bp1 = _fold_params(wp1, bp1, fold)
    wp2, bp2 = _fold_params(wp2, bp2, fold)

    tile = _pick_row_tile(R, n_row_bufs=4, lane_width=L)
    row_spec = pl.BlockSpec((tile, L), lambda i: (i, 0))
    w_spec = pl.BlockSpec((L, L), lambda i: (0, 0))
    b_spec = pl.BlockSpec((1, L), lambda i: (0, 0))

    real_f, imag_f = pl.pallas_call(
        _branch_kernel,
        out_shape=(jax.ShapeDtypeStruct((R, L), jnp.float32),
                   jax.ShapeDtypeStruct((R, L), jnp.float32)),
        grid=(R // tile,),
        in_specs=[row_spec, row_spec,
                  w_spec, b_spec, w_spec, b_spec,
                  w_spec, b_spec, w_spec, b_spec],
        out_specs=(row_spec, row_spec),
        compiler_params=_COMPILER_PARAMS,
    )(mag_f, pha_f, wa1, ba1, wa2, ba2, wp1, bp1, wp2, bp2)
    return real_f.reshape(P, C), imag_f.reshape(P, C)


def _run_post_fuse(crop2d, x2_2d, params):
    P, C = crop2d.shape
    fold = _fold_factor(P, C)
    L, R = C * fold, P // fold
    crop_f = crop2d.reshape(R, L)
    x2_f = x2_2d.reshape(R, L)

    wpo, bpo = _fold_params(*params["post"], fold)
    wfu, bfu = _fold_params(*params["fuse"], fold)

    tile = _pick_row_tile(R, n_row_bufs=3, lane_width=L)
    row_spec = pl.BlockSpec((tile, L), lambda i: (i, 0))
    w_spec = pl.BlockSpec((L, L), lambda i: (0, 0))
    b_spec = pl.BlockSpec((1, L), lambda i: (0, 0))

    out_f = pl.pallas_call(
        _post_fuse_kernel,
        out_shape=jax.ShapeDtypeStruct((R, L), jnp.float32),
        grid=(R // tile,),
        in_specs=[row_spec, row_spec, w_spec, b_spec, w_spec, b_spec],
        out_specs=row_spec,
        compiler_params=_COMPILER_PARAMS,
    )(crop_f, x2_f, wpo, bpo, wfu, bfu)
    return out_f.reshape(P, C)


# -----------------------------------------------------------------------------
# Host-side glue (NHWC path; FFT / resampling)
# -----------------------------------------------------------------------------
def _bilinear_up2_nhwc(x):
    """Exact F.interpolate(scale_factor=2, mode='bilinear', align_corners=False),
    expressed with edge-clamped shifts (slice+concat) rather than gathers."""
    def up_axis(v, axis):
        n = v.shape[axis]
        first = lax.slice_in_dim(v, 0, 1, axis=axis)
        last = lax.slice_in_dim(v, n - 1, n, axis=axis)
        prev = jnp.concatenate(
            [first, lax.slice_in_dim(v, 0, n - 1, axis=axis)], axis=axis)
        nxt = jnp.concatenate(
            [lax.slice_in_dim(v, 1, n, axis=axis), last], axis=axis)
        even = 0.25 * prev + 0.75 * v
        odd = 0.75 * v + 0.25 * nxt
        out = jnp.stack([even, odd], axis=axis + 1)
        new_shape = list(v.shape)
        new_shape[axis] = 2 * n
        return out.reshape(new_shape)

    x = up_axis(x, 1)   # H
    x = up_axis(x, 2)   # W
    return x


def _up2_repeat_nhwc(x):
    # repeat_interleave(2) along H and W (== nearest-neighbour exact 2x upsample).
    return jnp.repeat(jnp.repeat(x, 2, axis=1), 2, axis=2)


def init_params(channels, key):
    """Deterministic synthetic init of the six 1x1 convs (uniform +-1/sqrt(C))."""
    names = ["amp1", "amp2", "pha1", "pha2", "post", "fuse"]
    bound = 1.0 / math.sqrt(channels)
    params = {}
    keys = jax.random.split(key, 2 * len(names))
    for i, name in enumerate(names):
        w = jax.random.uniform(keys[2 * i], (channels, channels),
                               minval=-bound, maxval=bound, dtype=jnp.float32)
        b = jax.random.uniform(keys[2 * i + 1], (channels,),
                               minval=-bound, maxval=bound, dtype=jnp.float32)
        # store transposed (Cin, Cout) weights and (1, C) biases
        params[name] = (w.T, b.reshape(1, channels))
    return params


@jax.jit
def fresadd_forward(x, params):
    """fresadd (version=1): bilinear 2x branch + freup_Areadinterpolation branch."""
    n, c, h, w = x.shape
    xh = jnp.transpose(x, (0, 2, 3, 1))          # NHWC once at the boundary

    # ---- spatial branch: bilinear 2x upsample -------------------------------
    # TODO(synk): bilinear branch still materialized host-side; fusing it into
    # the post/fuse kernel would save one HBM pass over the 2Hx2W tensor.
    x2 = _bilinear_up2_nhwc(xh)

    # ---- frequency branch ----------------------------------------------------
    # TODO(synk): FFT/iFFT have no Pallas primitive; computed with jnp.fft.
    fx = jnp.fft.fft2(xh, axes=(1, 2))
    mag = jnp.abs(fx).astype(jnp.float32)
    pha = jnp.angle(fx).astype(jnp.float32)

    real2d, imag2d = _run_branch(mag.reshape(n * h * w, c),
                                 pha.reshape(n * h * w, c), params)
    real = real2d.reshape(n, h, w, c)
    imag = imag2d.reshape(n, h, w, c)

    # form the complex spectrum once, then a single 2x repeat_interleave
    spec = lax.complex(real, imag)
    spec_up = _up2_repeat_nhwc(spec)
    output = jnp.abs(jnp.fft.ifft2(spec_up, axes=(1, 2))).astype(jnp.float32)

    # quadrant crop back to (H, W)
    h2, w2 = h // 2, w // 2
    h32, w32 = (3 * h) // 2, (3 * w) // 2
    top = jnp.concatenate([output[:, :h2, :w2, :],
                           output[:, :h2, w32:2 * w, :]], axis=2)
    bot = jnp.concatenate([output[:, h32:2 * h, :w2, :],
                           output[:, h32:2 * h, w32:2 * w, :]], axis=2)
    crop = jnp.concatenate([top, bot], axis=1)

    # F.interpolate(crop, (2H, 2W)) with default mode='nearest' == 2x repeat
    crop_up = _up2_repeat_nhwc(crop)

    # ---- post conv + add + fuse conv (Pallas) --------------------------------
    out2d = _run_post_fuse(crop_up.reshape(n * 4 * h * w, c),
                           x2.reshape(n * 4 * h * w, c), params)
    out = out2d.reshape(n, 2 * h, 2 * w, c)
    return jnp.transpose(out, (0, 3, 1, 2))       # back to NCHW


# -----------------------------------------------------------------------------
# Pure-JAX reference (same math incl. bf16 MXU operands) for a correctness check
# -----------------------------------------------------------------------------
def _conv1x1_ref(x_nhwc, wT, b):
    y = jnp.einsum("nhwc,cd->nhwd",
                   x_nhwc.astype(jnp.bfloat16), wT.astype(jnp.bfloat16),
                   preferred_element_type=jnp.float32)
    return y + b.reshape(1, 1, 1, -1)


def fresadd_reference(x, params):
    n, c, h, w = x.shape
    xh = jnp.transpose(x, (0, 2, 3, 1))
    x2 = _bilinear_up2_nhwc(xh)
    fx = jnp.fft.fft2(xh, axes=(1, 2))
    mag = jnp.abs(fx).astype(jnp.float32)
    pha = jnp.angle(fx).astype(jnp.float32)

    def stack(z, p1, p2):
        hmid = _conv1x1_ref(z, *p1)
        hmid = jnp.where(hmid >= 0, hmid, LRELU_SLOPE * hmid)
        return _conv1x1_ref(hmid, *p2)

    Mag = stack(mag, params["amp1"], params["amp2"])
    Pha = stack(pha, params["pha1"], params["pha2"])
    amp_up = _up2_repeat_nhwc(Mag)
    pha_up = _up2_repeat_nhwc(Pha)
    output = jnp.abs(jnp.fft.ifft2(amp_up * jnp.cos(pha_up)
                                   + 1j * amp_up * jnp.sin(pha_up),
                                   axes=(1, 2))).astype(jnp.float32)
    h2, w2 = h // 2, w // 2
    h32, w32 = (3 * h) // 2, (3 * w) // 2
    top = jnp.concatenate([output[:, :h2, :w2, :],
                           output[:, :h2, w32:2 * w, :]], axis=2)
    bot = jnp.concatenate([output[:, h32:2 * h, :w2, :],
                           output[:, h32:2 * h, w32:2 * w, :]], axis=2)
    crop = jnp.concatenate([top, bot], axis=1)
    crop_up = _up2_repeat_nhwc(crop)
    x3 = _conv1x1_ref(crop_up, *params["post"])
    out = _conv1x1_ref(x2 + x3, *params["fuse"])
    return jnp.transpose(out, (0, 3, 1, 2))


if __name__ == "__main__":
    CHANNELS = 32     # fresadd default
    N, H, W = 2, 16, 16

    key = jax.random.PRNGKey(0)
    k_x, k_p = jax.random.split(key)
    x = jax.random.normal(k_x, (N, CHANNELS, H, W), dtype=jnp.float32)
    params = init_params(CHANNELS, k_p)

    out = jax.block_until_ready(fresadd_forward(x, params))
    assert out.shape == (N, CHANNELS, 2 * H, 2 * W), out.shape

    ref = jax.block_until_ready(fresadd_reference(x, params))
    # Tolerance covers bf16 MXU-operand rounding (both paths quantize identically;
    # residual differences come from f32 accumulation order only).
    err = float(jnp.max(jnp.abs(out - ref)))
    assert jnp.allclose(out, ref, rtol=1e-2, atol=1e-2), err

    print("KERNEL_OK")
</pallas_src>

<mosaic_0001>
module attributes {stable_mosaic.version = 11 : i64} {
  func.func @_branch_kernel(%arg0: i32, %arg1: memref<64x128xf32, #tpu.memory_space<vmem>>, %arg2: memref<64x128xf32, #tpu.memory_space<vmem>>, %arg3: memref<128x128xbf16, #tpu.memory_space<vmem>>, %arg4: memref<1x128xf32, #tpu.memory_space<vmem>>, %arg5: memref<128x128xbf16, #tpu.memory_space<vmem>>, %arg6: memref<1x128xf32, #tpu.memory_space<vmem>>, %arg7: memref<128x128xbf16, #tpu.memory_space<vmem>>, %arg8: memref<1x128xf32, #tpu.memory_space<vmem>>, %arg9: memref<128x128xbf16, #tpu.memory_space<vmem>>, %arg10: memref<1x128xf32, #tpu.memory_space<vmem>>, %arg11: memref<64x128xf32, #tpu.memory_space<vmem>>, %arg12: memref<64x128xf32, #tpu.memory_space<vmem>>) attributes {dimension_semantics = [#tpu.dimension_semantics<parallel>], iteration_bounds = array<i64: 2>, scalar_prefetch = 0 : i64, scratch_operands = 0 : i64, tpu.core_type = #tpu.core_type<tc>, window_params = [{transform_indices = @transform_0, window_bounds = array<i64: 64, 128>}, {transform_indices = @transform_1, window_bounds = array<i64: 64, 128>}, {pipeline_mode = #tpu.pipeline_mode<synchronous>, transform_indices = @transform_2, window_bounds = array<i64: 128, 128>}, {pipeline_mode = #tpu.pipeline_mode<synchronous>, transform_indices = @transform_3, window_bounds = array<i64: 1, 128>}, {pipeline_mode = #tpu.pipeline_mode<synchronous>, transform_indices = @transform_4, window_bounds = array<i64: 128, 128>}, {pipeline_mode = #tpu.pipeline_mode<synchronous>, transform_indices = @transform_5, window_bounds = array<i64: 1, 128>}, {pipeline_mode = #tpu.pipeline_mode<synchronous>, transform_indices = @transform_6, window_bounds = array<i64: 128, 128>}, {pipeline_mode = #tpu.pipeline_mode<synchronous>, transform_indices = @transform_7, window_bounds = array<i64: 1, 128>}, {pipeline_mode = #tpu.pipeline_mode<synchronous>, transform_indices = @transform_8, window_bounds = array<i64: 128, 128>}, {pipeline_mode = #tpu.pipeline_mode<synchronous>, transform_indices = @transform_9, window_bounds = array<i64: 1, 128>}, {transform_indices = @transform_10, window_bounds = array<i64: 64, 128>}, {transform_indices = @transform_11, window_bounds = array<i64: 64, 128>}]} {
    %c0 = arith.constant 0 : index
    %c0_0 = arith.constant 0 : index
    %0 = vector.load %arg1[%c0, %c0_0] : memref<64x128xf32, #tpu.memory_space<vmem>>, vector<64x128xf32>
    %c0_1 = arith.constant 0 : index
    %c0_2 = arith.constant 0 : index
    %1 = vector.load %arg3[%c0_1, %c0_2] : memref<128x128xbf16, #tpu.memory_space<vmem>>, vector<128x128xbf16>
    %c0_3 = arith.constant 0 : index
    %c0_4 = arith.constant 0 : index
    %2 = vector.load %arg4[%c0_3, %c0_4] : memref<1x128xf32, #tpu.memory_space<vmem>>, vector<1x128xf32>
    %c0_5 = arith.constant 0 : index
    %c0_6 = arith.constant 0 : index
    %3 = vector.load %arg5[%c0_5, %c0_6] : memref<128x128xbf16, #tpu.memory_space<vmem>>, vector<128x128xbf16>
    %c0_7 = arith.constant 0 : index
    %c0_8 = arith.constant 0 : index
    %4 = vector.load %arg6[%c0_7, %c0_8] : memref<1x128xf32, #tpu.memory_space<vmem>>, vector<1x128xf32>
    %5 = arith.truncf %0 : vector<64x128xf32> to vector<64x128xbf16>
    %cst = arith.constant dense<0.000000e+00> : vector<64x128xf32>
    %6 = tpu.matmul %5, %1, %cst {dimension_numbers = #tpu.dot_dimension_numbers<[1], [0], [0], [1], [0, 0, 1, 1], [], []>} : vector<64x128xbf16>, vector<128x128xbf16>, vector<64x128xf32> -> vector<64x128xf32>
    %7 = vector.broadcast %2 : vector<1x128xf32> to vector<64x128xf32>
    %8 = arith.addf %6, %7 : vector<64x128xf32>
    %cst_9 = arith.constant 0.000000e+00 : f32
    %9 = vector.broadcast %cst_9 : f32 to vector<64x128xf32>
    %10 = arith.cmpf oge, %8, %9 : vector<64x128xf32>
    %cst_10 = arith.constant 1.000000e-01 : f32
    %11 = vector.broadcast %cst_10 : f32 to vector<64x128xf32>
    %12 = arith.mulf %11, %8 : vector<64x128xf32>
    %13 = arith.select %10, %8, %12 : vector<64x128xi1>, vector<64x128xf32>
    %14 = arith.truncf %13 : vector<64x128xf32> to vector<64x128xbf16>
    %cst_11 = arith.constant dense<0.000000e+00> : vector<64x128xf32>
    %15 = tpu.matmul %14, %3, %cst_11 {dimension_numbers = #tpu.dot_dimension_numbers<[1], [0], [0], [1], [0, 0, 1, 1], [], []>} : vector<64x128xbf16>, vector<128x128xbf16>, vector<64x128xf32> -> vector<64x128xf32>
    %16 = vector.broadcast %4 : vector<1x128xf32> to vector<64x128xf32>
    %17 = arith.addf %15, %16 : vector<64x128xf32>
    %c0_12 = arith.constant 0 : index
    %c0_13 = arith.constant 0 : index
    %18 = vector.load %arg2[%c0_12, %c0_13] : memref<64x128xf32, #tpu.memory_space<vmem>>, vector<64x128xf32>
    %c0_14 = arith.constant 0 : index
    %c0_15 = arith.constant 0 : index
    %19 = vector.load %arg7[%c0_14, %c0_15] : memref<128x128xbf16, #tpu.memory_space<vmem>>, vector<128x128xbf16>
    %c0_16 = arith.constant 0 : index
    %c0_17 = arith.constant 0 : index
    %20 = vector.load %arg8[%c0_16, %c0_17] : memref<1x128xf32, #tpu.memory_space<vmem>>, vector<1x128xf32>
    %c0_18 = arith.constant 0 : index
    %c0_19 = arith.constant 0 : index
    %21 = vector.load %arg9[%c0_18, %c0_19] : memref<128x128xbf16, #tpu.memory_space<vmem>>, vector<128x128xbf16>
    %c0_20 = arith.constant 0 : index
    %c0_21 = arith.constant 0 : index
    %22 = vector.load %arg10[%c0_20, %c0_21] : memref<1x128xf32, #tpu.memory_space<vmem>>, vector<1x128xf32>
    %23 = arith.truncf %18 : vector<64x128xf32> to vector<64x128xbf16>
    %cst_22 = arith.constant dense<0.000000e+00> : vector<64x128xf32>
    %24 = tpu.matmul %23, %19, %cst_22 {dimension_numbers = #tpu.dot_dimension_numbers<[1], [0], [0], [1], [0, 0, 1, 1], [], []>} : vector<64x128xbf16>, vector<128x128xbf16>, vector<64x128xf32> -> vector<64x128xf32>
    %25 = vector.broadcast %20 : vector<1x128xf32> to vector<64x128xf32>
    %26 = arith.addf %24, %25 : vector<64x128xf32>
    %cst_23 = arith.constant 0.000000e+00 : f32
    %27 = vector.broadcast %cst_23 : f32 to vector<64x128xf32>
    %28 = arith.cmpf oge, %26, %27 : vector<64x128xf32>
    %cst_24 = arith.constant 1.000000e-01 : f32
    %29 = vector.broadcast %cst_24 : f32 to vector<64x128xf32>
    %30 = arith.mulf %29, %26 : vector<64x128xf32>
    %31 = arith.select %28, %26, %30 : vector<64x128xi1>, vector<64x128xf32>
    %32 = arith.truncf %31 : vector<64x128xf32> to vector<64x128xbf16>
    %cst_25 = arith.constant dense<0.000000e+00> : vector<64x128xf32>
    %33 = tpu.matmul %32, %21, %cst_25 {dimension_numbers = #tpu.dot_dimension_numbers<[1], [0], [0], [1], [0, 0, 1, 1], [], []>} : vector<64x128xbf16>, vector<128x128xbf16>, vector<64x128xf32> -> vector<64x128xf32>
    %34 = vector.broadcast %22 : vector<1x128xf32> to vector<64x128xf32>
    %35 = arith.addf %33, %34 : vector<64x128xf32>
    %36 = math.cos %35 : vector<64x128xf32>
    %37 = arith.mulf %17, %36 : vector<64x128xf32>
    %c0_26 = arith.constant 0 : index
    %c0_27 = arith.constant 0 : index
    %38 = vector.load %arg11[%c0_26, %c0_27] : memref<64x128xf32, #tpu.memory_space<vmem>>, vector<64x128xf32>
    tpu.vector_store %arg11[%c0_26, %c0_27], %37 {strides = array<i32>} : memref<64x128xf32, #tpu.memory_space<vmem>>, vector<64x128xf32>,
    %39 = math.sin %35 : vector<64x128xf32>
    %40 = arith.mulf %17, %39 : vector<64x128xf32>
    %c0_28 = arith.constant 0 : index
    %c0_29 = arith.constant 0 : index
    %41 = vector.load %arg12[%c0_28, %c0_29] : memref<64x128xf32, #tpu.memory_space<vmem>>, vector<64x128xf32>
    tpu.vector_store %arg12[%c0_28, %c0_29], %40 {strides = array<i32>} : memref<64x128xf32, #tpu.memory_space<vmem>>, vector<64x128xf32>,
    return
  }
  func.func @transform_0(%arg0: i32) -> (i32, i32) {
    %c0_i32 = arith.constant 0 : i32
    %c0_i32_0 = arith.constant 0 : i32
    return %arg0, %c0_i32 : i32, i32
  }
  func.func @transform_1(%arg0: i32) -> (i32, i32) {
    %c0_i32 = arith.constant 0 : i32
    %c0_i32_0 = arith.constant 0 : i32
    return %arg0, %c0_i32 : i32, i32
  }
  func.func @transform_2(%arg0: i32) -> (i32, i32) {
    %c0_i32 = arith.constant 0 : i32
    %c0_i32_0 = arith.constant 0 : i32
    %c0_i32_1 = arith.constant 0 : i32
    return %c0_i32, %c0_i32_0 : i32, i32
  }
  func.func @transform_3(%arg0: i32) -> (i32, i32) {
    %c0_i32 = arith.constant 0 : i32
    %c0_i32_0 = arith.constant 0 : i32
    %c0_i32_1 = arith.constant 0 : i32
    return %c0_i32, %c0_i32_0 : i32, i32
  }
  func.func @transform_4(%arg0: i32) -> (i32, i32) {
    %c0_i32 = arith.constant 0 : i32
    %c0_i32_0 = arith.constant 0 : i32
    %c0_i32_1 = arith.constant 0 : i32
    return %c0_i32, %c0_i32_0 : i32, i32
  }
  func.func @transform_5(%arg0: i32) -> (i32, i32) {
    %c0_i32 = arith.constant 0 : i32
    %c0_i32_0 = arith.constant 0 : i32
    %c0_i32_1 = arith.constant 0 : i32
    return %c0_i32, %c0_i32_0 : i32, i32
  }
  func.func @transform_6(%arg0: i32) -> (i32, i32) {
    %c0_i32 = arith.constant 0 : i32
    %c0_i32_0 = arith.constant 0 : i32
    %c0_i32_1 = arith.constant 0 : i32
    return %c0_i32, %c0_i32_0 : i32, i32
  }
  func.func @transform_7(%arg0: i32) -> (i32, i32) {
    %c0_i32 = arith.constant 0 : i32
    %c0_i32_0 = arith.constant 0 : i32
    %c0_i32_1 = arith.constant 0 : i32
    return %c0_i32, %c0_i32_0 : i32, i32
  }
  func.func @transform_8(%arg0: i32) -> (i32, i32) {
    %c0_i32 = arith.constant 0 : i32
    %c0_i32_0 = arith.constant 0 : i32
    %c0_i32_1 = arith.constant 0 : i32
    return %c0_i32, %c0_i32_0 : i32, i32
  }
  func.func @transform_9(%arg0: i32) -> (i32, i32) {
    %c0_i32 = arith.constant 0 : i32
    %c0_i32_0 = arith.constant 0 : i32
    %c0_i32_1 = arith.constant 0 : i32
    return %c0_i32, %c0_i32_0 : i32, i32
  }
  func.func @transform_10(%arg0: i32) -> (i32, i32) {
    %c0_i32 = arith.constant 0 : i32
    %c0_i32_0 = arith.constant 0 : i32
    return %arg0, %c0_i32 : i32, i32
  }
  func.func @transform_11(%arg0: i32) -> (i32, i32) {
    %c0_i32 = arith.constant 0 : i32
    %c0_i32_0 = arith.constant 0 : i32
    return %arg0, %c0_i32 : i32, i32
  }
}

module attributes {stable_mosaic.version = 11 : i64} {
  func.func @_post_fuse_kernel(%arg0: i32, %arg1: memref<256x128xf32, #tpu.memory_space<vmem>>, %arg2: memref<256x128xf32, #tpu.memory_space<vmem>>, %arg3: memref<128x128xbf16, #tpu.memory_space<vmem>>, %arg4: memref<1x128xf32, #tpu.memory_space<vmem>>, %arg5: memref<128x128xbf16, #tpu.memory_space<vmem>>, %arg6: memref<1x128xf32, #tpu.memory_space<vmem>>, %arg7: memref<256x128xf32, #tpu.memory_space<vmem>>) attributes {dimension_semantics = [#tpu.dimension_semantics<parallel>], iteration_bounds = array<i64: 2>, scalar_prefetch = 0 : i64, scratch_operands = 0 : i64, tpu.core_type = #tpu.core_type<tc>, window_params = [{transform_indices = @transform_0, window_bounds = array<i64: 256, 128>}, {transform_indices = @transform_1, window_bounds = array<i64: 256, 128>}, {pipeline_mode = #tpu.pipeline_mode<synchronous>, transform_indices = @transform_2, window_bounds = array<i64: 128, 128>}, {pipeline_mode = #tpu.pipeline_mode<synchronous>, transform_indices = @transform_3, window_bounds = array<i64: 1, 128>}, {pipeline_mode = #tpu.pipeline_mode<synchronous>, transform_indices = @transform_4, window_bounds = array<i64: 128, 128>}, {pipeline_mode = #tpu.pipeline_mode<synchronous>, transform_indices = @transform_5, window_bounds = array<i64: 1, 128>}, {transform_indices = @transform_6, window_bounds = array<i64: 256, 128>}]} {
    %c0 = arith.constant 0 : index
    %c0_0 = arith.constant 0 : index
    %0 = vector.load %arg1[%c0, %c0_0] : memref<256x128xf32, #tpu.memory_space<vmem>>, vector<256x128xf32>
    %1 = arith.truncf %0 : vector<256x128xf32> to vector<256x128xbf16>
    %c0_1 = arith.constant 0 : index
    %c0_2 = arith.constant 0 : index
    %2 = vector.load %arg3[%c0_1, %c0_2] : memref<128x128xbf16, #tpu.memory_space<vmem>>, vector<128x128xbf16>
    %cst = arith.constant dense<0.000000e+00> : vector<256x128xf32>
    %3 = tpu.matmul %1, %2, %cst {dimension_numbers = #tpu.dot_dimension_numbers<[1], [0], [0], [1], [0, 0, 1, 1], [], []>} : vector<256x128xbf16>, vector<128x128xbf16>, vector<256x128xf32> -> vector<256x128xf32>
    %c0_3 = arith.constant 0 : index
    %c0_4 = arith.constant 0 : index
    %4 = vector.load %arg4[%c0_3, %c0_4] : memref<1x128xf32, #tpu.memory_space<vmem>>, vector<1x128xf32>
    %5 = vector.broadcast %4 : vector<1x128xf32> to vector<256x128xf32>
    %6 = arith.addf %3, %5 : vector<256x128xf32>
    %c0_5 = arith.constant 0 : index
    %c0_6 = arith.constant 0 : index
    %7 = vector.load %arg2[%c0_5, %c0_6] : memref<256x128xf32, #tpu.memory_space<vmem>>, vector<256x128xf32>
    %8 = arith.addf %7, %6 : vector<256x128xf32>
    %9 = arith.truncf %8 : vector<256x128xf32> to vector<256x128xbf16>
    %c0_7 = arith.constant 0 : index
    %c0_8 = arith.constant 0 : index
    %10 = vector.load %arg5[%c0_7, %c0_8] : memref<128x128xbf16, #tpu.memory_space<vmem>>, vector<128x128xbf16>
    %cst_9 = arith.constant dense<0.000000e+00> : vector<256x128xf32>
    %11 = tpu.matmul %9, %10, %cst_9 {dimension_numbers = #tpu.dot_dimension_numbers<[1], [0], [0], [1], [0, 0, 1, 1], [], []>} : vector<256x128xbf16>, vector<128x128xbf16>, vector<256x128xf32> -> vector<256x128xf32>
    %c0_10 = arith.constant 0 : index
    %c0_11 = arith.constant 0 : index
    %12 = vector.load %arg6[%c0_10, %c0_11] : memref<1x128xf32, #tpu.memory_space<vmem>>, vector<1x128xf32>
    %13 = vector.broadcast %12 : vector<1x128xf32> to vector<256x128xf32>
    %14 = arith.addf %11, %13 : vector<256x128xf32>
    %c0_12 = arith.constant 0 : index
    %c0_13 = arith.constant 0 : index
    %15 = vector.load %arg7[%c0_12, %c0_13] : memref<256x128xf32, #tpu.memory_space<vmem>>, vector<256x128xf32>
    tpu.vector_store %arg7[%c0_12, %c0_13], %14 {strides = array<i32>} : memref<256x128xf32, #tpu.memory_space<vmem>>, vector<256x128xf32>,
    return
  }
  func.func @transform_0(%arg0: i32) -> (i32, i32) {
    %c0_i32 = arith.constant 0 : i32
    %c0_i32_0 = arith.constant 0 : i32
    return %arg0, %c0_i32 : i32, i32
  }
  func.func @transform_1(%arg0: i32) -> (i32, i32) {
    %c0_i32 = arith.constant 0 : i32
    %c0_i32_0 = arith.constant 0 : i32
    return %arg0, %c0_i32 : i32, i32
  }
  func.func @transform_2(%arg0: i32) -> (i32, i32) {
    %c0_i32 = arith.constant 0 : i32
    %c0_i32_0 = arith.constant 0 : i32
    %c0_i32_1 = arith.constant 0 : i32
    return %c0_i32, %c0_i32_0 : i32, i32
  }
  func.func @transform_3(%arg0: i32) -> (i32, i32) {
    %c0_i32 = arith.constant 0 : i32
    %c0_i32_0 = arith.constant 0 : i32
    %c0_i32_1 = arith.constant 0 : i32
    return %c0_i32, %c0_i32_0 : i32, i32
  }
  func.func @transform_4(%arg0: i32) -> (i32, i32) {
    %c0_i32 = arith.constant 0 : i32
    %c0_i32_0 = arith.constant 0 : i32
    %c0_i32_1 = arith.constant 0 : i32
    return %c0_i32, %c0_i32_0 : i32, i32
  }
  func.func @transform_5(%arg0: i32) -> (i32, i32) {
    %c0_i32 = arith.constant 0 : i32
    %c0_i32_0 = arith.constant 0 : i32
    %c0_i32_1 = arith.constant 0 : i32
    return %c0_i32, %c0_i32_0 : i32, i32
  }
  func.func @transform_6(%arg0: i32) -> (i32, i32) {
    %c0_i32 = arith.constant 0 : i32
    %c0_i32_0 = arith.constant 0 : i32
    return %arg0, %c0_i32 : i32, i32
  }
}

</mosaic_0001>

<bundles_post_ra>
// kernel: fresadd_forward.2
= control target key start
LH: loop header
LB: loop body
LE: loop exit
PB: predicated region body
PF: predicated region fallthrough
CT: control target
= control target key end

     0   :  { %s3285_s17 = smov 0   ;;  %s4248_s0 = inlined_call_operand.vmem [shape: f32[128,128], index: 0, kind: input, shape index: {}]   ;;  %s4249_s1 = inlined_call_operand.vmem [shape: f32[128,128], index: 1, kind: input, shape index: {}]   ;;  %s4250_s2 = inlined_call_operand.vmem [shape: bf16[128,128], index: 2, kind: input, shape index: {}]   ;;  %s4251_s3 = inlined_call_operand.vmem [shape: f32[1,128], index: 3, kind: input, shape index: {}]   ;;  %s4252_s4 = inlined_call_operand.vmem [shape: bf16[128,128], index: 4, kind: input, shape index: {}]   ;;  %s4253_s5 = inlined_call_operand.vmem [shape: f32[1,128], index: 5, kind: input, shape index: {}]   ;;  %s4254_s6 = inlined_call_operand.vmem [shape: bf16[128,128], index: 6, kind: input, shape index: {}]   ;;  %s4255_s7 = inlined_call_operand.vmem [shape: f32[1,128], index: 7, kind: input, shape index: {}]   ;;  %s4256_s8 = inlined_call_operand.vmem [shape: bf16[128,128], index: 8, kind: input, shape index: {}]   ;;  %s4257_s9 = inlined_call_operand.vmem [shape: f32[1,128], index: 9, kind: input, shape index: {}]   ;;  %s4258_s10 = inlined_call_operand.vmem [shape: f32[128,128], index: 10, kind: output, shape index: {0}]   ;;  %s4259_s11 = inlined_call_operand.vmem [shape: f32[128,128], index: 11, kind: output, shape index: {1}]  }
   0x1 LB: > { %s2841_s18 = sadd.s32 4294967295, %s3217_s17   ;;  %p2845_p0 = scmp.ge.s32.totalorder %s3217_s17, 1  ;;  %s3217_s17 = sphi %s3285_s17, %s22_s17  }
   0x2   : > { %p352_p1 = scmp.lt.s32.totalorder %s3217_s17, 3 }
   0x4   : > { %p353_p2 = pnand %p2845_p0, %p352_p1 }
   0x5   : > { %v3146_v0 = vld [vmem:[%s4250_s2] sm:$0xff] (!%p353_p2)   ;;  %s2846_s21 = sshll.u32 (!%p353_p2), %s2841_s18, 3  ;;  %v3147_v1 = vld [vmem:[%s4250_s2 + $0x8] sm:$0xff] (!%p353_p2)   ;;  %v3148_v2 = vld [vmem:[%s4250_s2 + $0x10] sm:$0xff] (!%p353_p2)  }
   0x6   : > { %356 = sbr.rel (%p353_p2) target bundleno = 760 (0x2f8), region = 60  ;;  %p403_p3 = scmp.lt.s32.totalorder (!%p353_p2), %s2846_s21, 15  ;;  %3004 = vmatprep.subr.bf16.mxu0 (!%p353_p2), %v3146_v0  ;;  %v3149_v3 = vld [vmem:[%s4250_s2 + $0x18] sm:$0xff] (!%p353_p2)   ;;  %v3150_v7 = vld [vmem:[%s4250_s2 + $0x20] sm:$0xff] (!%p353_p2)   ;;  %v3151_v8 = vld [vmem:[%s4250_s2 + $0x28] sm:$0xff] (!%p353_p2)  }
   0x7   : > { %3005 = vmatpush3.bf16.msra.mxu0 (!%p353_p2), %v3146_v0  ;;  %v3152_v9 = vld [vmem:[%s4250_s2 + $0x30] sm:$0xff] (!%p353_p2)   ;;  %v3162_v10 = vld [vmem:[%s4252_s4] sm:$0xff] (!%p353_p2)   ;;  %v3163_v11 = vld [vmem:[%s4252_s4 + $0x8] sm:$0xff] (!%p353_p2)  }
   0x8   : > { %3006 = vmatprep.subr.bf16.mxu0 (!%p353_p2), %v3147_v1  ;;  %v3153_v12 = vld [vmem:[%s4250_s2 + $0x38] sm:$0xff] (!%p353_p2)   ;;  %3028 = vmatprep.subr.bf16.mxu1 (!%p353_p2), %v3162_v10  ;;  %v3154_v15 = vld [vmem:[%s4254_s6] sm:$0xff] (!%p353_p2)   ;;  %v3164_v18 = vld [vmem:[%s4252_s4 + $0x10] sm:$0xff] (!%p353_p2)  }
   0x9   : > { %3029 = vmatpush3.bf16.msra.mxu1 (!%p353_p2), %v3162_v10  ;;  %v3165_v19 = vld [vmem:[%s4252_s4 + $0x18] sm:$0xff] (!%p353_p2)   ;;  %v3155_v21 = vld [vmem:[%s4254_s6 + $0x8] sm:$0xff] (!%p353_p2)   ;;  %v3166_v23 = vld [vmem:[%s4252_s4 + $0x20] sm:$0xff] (!%p353_p2)  }
   0xa   : > { %3030 = vmatprep.subr.bf16.mxu1 (!%p353_p2), %v3163_v11  ;;  %v3156_v26 = vld [vmem:[%s4254_s6 + $0x10] sm:$0xff] (!%p353_p2)   ;;  %v3157_v31 = vld [vmem:[%s4254_s6 + $0x18] sm:$0xff] (!%p353_p2)   ;;  %v3158_v32 = vld [vmem:[%s4254_s6 + $0x20] sm:$0xff] (!%p353_p2)  }
   0xb   : > { %3007 = vmatpush3.bf16.msra.mxu0 (!%p353_p2), %v3147_v1  ;;  %v3159_v33 = vld [vmem:[%s4254_s6 + $0x28] sm:$0xff] (!%p353_p2)   ;;  %v3160_v34 = vld [vmem:[%s4254_s6 + $0x30] sm:$0xff] (!%p353_p2)   ;;  %v3161_v35 = vld [vmem:[%s4254_s6 + $0x38] sm:$0xff] (!%p353_p2)  }
   0xc   : > { %3008 = vmatprep.subr.bf16.mxu0 (!%p353_p2), %v3148_v2  ;;  %v3167_v45 = vld [vmem:[%s4252_s4 + $0x28] sm:$0xff] (!%p353_p2)   ;;  %v3168_v46 = vld [vmem:[%s4252_s4 + $0x30] sm:$0xff] (!%p353_p2)   ;;  %v3169_v47 = vld [vmem:[%s4252_s4 + $0x38] sm:$0xff] (!%p353_p2)  }
   0xd   : > { %s4275_s21 = smov (!%p403_p3, %s2846_s21), 15  ;;  %3031 = vmatpush3.bf16.msra.mxu1 %v3163_v11  ;;  %v3170_v48 = vld [vmem:[%s4256_s8] sm:$0xff]  }
   0xe   : > { %s3302_s26 = sshll.u32 %s4275_s21, 3  ;;  %3032 = vmatprep.subr.bf16.mxu1 %v3164_v18  ;;  %v2854_v49 = vld [vmem:[%s4251_s3] ss:$0 sm:$0xff] }
   0xf   : > { %s3308_s29 = scalar_lea.vmem %s4248_s0, %s3302_s26  ;;  %3009 = vmatpush3.bf16.msra.mxu0 %v3148_v2  ;;  %s3353_s20 = scalar_lea.vmem %s4249_s1, %s3302_s26 }
  0x10   : > { %v427_v4 = vld [vmem:[%s3308_s29] sm:$0xff]  ;;  %v428_v5 = vld [vmem:[%s3308_s29 + $0x8] sm:$0xff]  ;;  %3010 = vmatprep.subr.bf16.mxu0 %v3149_v3  ;;  %v429_v13 = vld [vmem:[%s3308_s29 + $0x10] sm:$0xff]  ;;  %s3763_s15 = scalar_lea.vmem %s4258_s10, %s3302_s26  ;;  %s3769_s19 = scalar_lea.vmem %s4259_s11, %s3302_s26 }
  0x11   : > { %v469_v6 = vpack.c.bf16 %v428_v5, %v427_v4  ;;  %v430_v14 = vld [vmem:[%s3308_s29 + $0x18] sm:$0xff]  ;;  %v431_v16 = vld [vmem:[%s3308_s29 + $0x20] sm:$0xff]  ;;  %v432_v17 = vld [vmem:[%s3308_s29 + $0x28] sm:$0xff]  ;;  %3033 = vmatpush3.bf16.msra.mxu1 %v3164_v18 }
  0x12   : > { %v470_v20 = vpack.c.bf16 %v430_v14, %v429_v13  ;;  %v471_v22 = vpack.c.bf16 %v432_v17, %v431_v16  ;;  %3034 = vmatprep.subr.bf16.mxu1 %v3165_v19  ;;  %v433_v24 = vld [vmem:[%s3308_s29 + $0x30] sm:$0xff]  ;;  %v434_v25 = vld [vmem:[%s3308_s29 + $0x38] sm:$0xff]  ;;  %v739_v27 = vld [vmem:[%s3353_s20] sm:$0xff] }
  0x13   : > { %3020 = vmatprep.mubr.bf16.mxu0 %v469_v6  ;;  %3011 = vmatpush3.bf16.msra.mxu0 %v3149_v3  ;;  %v740_v28 = vld [vmem:[%s3353_s20 + $0x8] sm:$0xff]  ;;  %v472_v29 = vpack.c.bf16 %v434_v25, %v433_v24  ;;  %v741_v36 = vld [vmem:[%s3353_s20 + $0x10] sm:$0xff]  ;;  %v742_v37 = vld [vmem:[%s3353_s20 + $0x18] sm:$0xff] }
  0x14   : > { %3012 = vmatprep.subr.bf16.mxu0 %v3150_v7  ;;  %v781_v30 = vpack.c.bf16 %v740_v28, %v739_v27  ;;  %v743_v38 = vld [vmem:[%s3353_s20 + $0x20] sm:$0xff]  ;;  %v744_v39 = vld [vmem:[%s3353_s20 + $0x28] sm:$0xff]  ;;  %v782_v40 = vpack.c.bf16 %v742_v37, %v741_v36  ;;  %v745_v42 = vld [vmem:[%s3353_s20 + $0x30] sm:$0xff] }
  0x15   : > { %3035 = vmatpush3.bf16.msra.mxu1 %v3165_v19  ;;  %v783_v41 = vpack.c.bf16 %v744_v39, %v743_v38  ;;  %v746_v43 = vld [vmem:[%s3353_s20 + $0x38] sm:$0xff]  ;;  %v3172_v18 = vld [vmem:[%s4256_s8 + $0x10] sm:$0xff]   ;;  %v3174_v25 = vld [vmem:[%s4256_s8 + $0x20] sm:$0xff]  }
  0x16   : > { %3036 = vmatprep.subr.bf16.mxu1 %v3166_v23  ;;  %v784_v44 = vpack.c.bf16 %v746_v43, %v745_v42  ;;  %v3173_v24 = vld [vmem:[%s4256_s8 + $0x18] sm:$0xff]   ;;  %v2872_v27 = vld [vmem:[%s4255_s7] ss:$0 sm:$0xff]  ;;  %v3176_v28 = vld [vmem:[%s4256_s8 + $0x30] sm:$0xff]  }
  0x17   : > { %3013 = vmatpush3.bf16.msra.mxu0 %v3150_v7 }
  0x18   : > { %3014 = vmatprep.subr.bf16.mxu0 %v3151_v8 }
  0x19   : > { %3037 = vmatpush3.bf16.msra.mxu1 %v3166_v23 }
  0x1a   : > { %3038 = vmatprep.subr.bf16.mxu1 %v3167_v45 }
  0x1b   : > { %3015 = vmatpush3.bf16.msra.mxu0 %v3151_v8  ;;  %v3171_v8 = vld [vmem:[%s4256_s8 + $0x8] sm:$0xff]  }
  0x1c   : > { %3016 = vmatprep.subr.bf16.mxu0 %v3152_v9 }
  0x1d   : > { %3039 = vmatpush3.bf16.msra.mxu1 %v3167_v45 }
  0x1e   : > { %3040 = vmatprep.subr.bf16.mxu1 %v3168_v46 }
  0x1f   : > { %3017 = vmatpush3.bf16.msra.mxu0 %v3152_v9 }
  0x20   : > { %3018 = vmatprep.subr.bf16.mxu0 %v3153_v12 }
  0x21   : > { %3041 = vmatpush3.bf16.msra.mxu1 %v3168_v46 }
  0x22   : > { %3042 = vmatprep.subr.bf16.mxu1 %v3169_v47 }
  0x23   : > { %3019 = vmatpush3.bf16.msra.mxu0 %v3153_v12 }
  0x24   : > { %3052 = vmatprep.subr.bf16.mxu0 %v3154_v15 }
  0x25   : > { %3043 = vmatpush3.bf16.msra.mxu1 %v3169_v47 }
  0x26   : > { %3021 = vmatmul.mubr.bf16.vlgmr.msra.gmra.mrb[0].mxu0 %v470_v20  ;;  %3076 = vmatprep.subr.bf16.mxu1 %v3170_v48 }
  0x27   : > { %3053 = vmatpush3.bf16.msra.mxu0 %v3154_v15  ;;  %3024 = vmatprep.mubr.bf16.mxu0 %v471_v22 }
  0x28   : > { %3054 = vmatprep.subr.bf16.mxu0 %v3155_v21 }
  0x2b   : > { %3055 = vmatpush3.bf16.msra.mxu0 %v3155_v21 }
  0x2c   : > { %3056 = vmatprep.subr.bf16.mxu0 %v3156_v26 }
  0x2e   : > { %3025 = vmatmul.mubr.bf16.gmra.mrb[4].mxu0 %v472_v29 }
  0x2f   : > { %3057 = vmatpush3.bf16.msra.mxu0 %v3156_v26  ;;  %3068 = vmatprep.mubr.bf16.mxu0 %v781_v30  ;;  %v3175_v26 = vld [vmem:[%s4256_s8 + $0x28] sm:$0xff]  }
  0x30   : > { %3058 = vmatprep.subr.bf16.mxu0 %v3157_v31 }
  0x33   : > { %3059 = vmatpush3.bf16.msra.mxu0 %v3157_v31 }
  0x34   : > { %3060 = vmatprep.subr.bf16.mxu0 %v3158_v32 }
  0x37   : > { %3061 = vmatpush3.bf16.msra.mxu0 %v3158_v32 }
  0x38   : > { %3062 = vmatprep.subr.bf16.mxu0 %v3159_v33 }
  0x3b   : > { %3063 = vmatpush3.bf16.msra.mxu0 %v3159_v33 }
  0x3c   : > { %3064 = vmatprep.subr.bf16.mxu0 %v3160_v34 }
  0x3f   : > { %3065 = vmatpush3.bf16.msra.mxu0 %v3160_v34  ;;  %v3177_v34 = vld [vmem:[%s4256_s8 + $0x38] sm:$0xff]  }
  0x40   : > { %3066 = vmatprep.subr.bf16.mxu0 %v3161_v35 }
  0x43   : > { %3067 = vmatpush3.bf16.msra.mxu0 %v3161_v35 }
  0x46   : > { %3069 = vmatmul.mubr.bf16.vlgmr.msra.gmra.mrb[8].mxu0 %v782_v40 }
  0x47   : > { %3072 = vmatprep.mubr.bf16.mxu0 %v783_v41 }
  0x4e   : > { %3073 = vmatmul.mubr.bf16.gmra.mrb[12].mxu0 %v784_v44 }
  0xf9   : > { %v3022_v50 = vpop.f32.mrb[0].mxu0 }
  0xfa   : > { %v570_v51 = vadd.f32 %v3022_v50, %v2854_v49  ;;  %v561_v52 = vpop.f32.mrb[1].mxu0 }
  0xfb   : > { %v562_v53 = vadd.f32 %v2854_v49, %v561_v52  ;;  %v3023_v54 = vpop.f32.mrb[2].mxu0 }
  0xfc   : > { %v602_v55 = vmul.f32 0.1, %v570_v51  ;;  %v573_v56 = vadd.f32 %v3023_v54, %v2854_v49  ;;  %v564_v57 = vpop.f32.mrb[3].mxu0  ;;  %vm594_vm0 = vcmp.ge.f32.partialorder %v570_v51, 0.0 }
  0xfd   : > { %v600_v58 = vmul.f32 0.1, %v562_v53  ;;  %v565_v59 = vadd.f32 %v2854_v49, %v564_v57  ;;  %vm592_vm2 = vcmp.ge.f32.partialorder %v562_v53, 0.0 }
  0xfe   : > { %vm595_vm1 = vcmp.ge.f32.partialorder %v573_v56, 0.0  ;;  %v603_v60 = vmul.f32 0.1, %v573_v56  ;;  %v610_v62 = vsel %vm594_vm0, %v570_v51, %v602_v55 }
  0xff   : > { %v601_v61 = vmul.f32 0.1, %v565_v59  ;;  %vm593_vm3 = vcmp.ge.f32.partialorder %v565_v59, 0.0  ;;  %v608_v0 = vsel %vm592_vm2, %v562_v53, %v600_v58 }
 0x100   : > { %v611_v63 = vsel %vm595_vm1, %v573_v56, %v603_v60 }
 0x101   : > { %v609_v1 = vsel %vm593_vm3, %v565_v59, %v601_v61  ;;  %v617_v2 = vpack.c.bf16 %v611_v63, %v610_v62  ;;  %v3026_v3 = vpop.f32.mrb[4].mxu0 }
 0x102   : > { %v616_v4 = vpack.c.bf16 %v609_v1, %v608_v0  ;;  %v586_v5 = vadd.f32 %v3026_v3, %v2854_v49  ;;  %v577_v6 = vpop.f32.mrb[5].mxu0 }
 0x103   : > { %v578_v7 = vadd.f32 %v2854_v49, %v577_v6  ;;  %v3027_v9 = vpop.f32.mrb[6].mxu0 }
 0x104   : > { %3044 = vmatprep.mubr.bf16.mxu1 %v616_v4  ;;  %vm598_vm4 = vcmp.ge.f32.partialorder %v586_v5, 0.0  ;;  %v606_v10 = vmul.f32 0.1, %v586_v5  ;;  %v589_v11 = vadd.f32 %v3027_v9, %v2854_v49  ;;  %v580_v12 = vpop.f32.mrb[7].mxu0 }
 0x105   : > { %3045 = vmatmul.mubr.bf16.vlgmr.msra.gmra.mrb[0].mxu1 %v617_v2  ;;  %vm596_vm5 = vcmp.ge.f32.partialorder %v578_v7, 0.0  ;;  %v604_v13 = vmul.f32 0.1, %v578_v7  ;;  %v581_v14 = vadd.f32 %v2854_v49, %v580_v12 }
 0x106   : > { %3077 = vmatpush3.bf16.msra.mxu1 %v3170_v48  ;;  %vm599_vm6 = vcmp.ge.f32.partialorder %v589_v11, 0.0  ;;  %v607_v15 = vmul.f32 0.1, %v589_v11  ;;  %v614_v16 = vsel %vm598_vm4, %v586_v5, %v606_v10  ;;  %v3434_v5 = vld [vmem:[%s4253_s5] ss:$0 sm:$0xff] }
 0x107   : > { %3078 = vmatprep.subr.bf16.mxu1 %v3171_v8  ;;  %vm597_vm7 = vcmp.ge.f32.partialorder %v581_v14, 0.0  ;;  %v605_v17 = vmul.f32 0.1, %v581_v14  ;;  %v612_v19 = vsel %vm596_vm5, %v578_v7, %v604_v13 }
 0x108   : > { %v615_v20 = vsel %vm599_vm6, %v589_v11, %v607_v15 }
 0x109   : > { %v613_v21 = vsel %vm597_vm7, %v581_v14, %v605_v17  ;;  %v619_v22 = vpack.c.bf16 %v615_v20, %v614_v16  ;;  %v3454_v16 = vld [vmem:[%s4257_s9] ss:$0 sm:$0xff] }
 0x10a   : > { %3079 = vmatpush3.bf16.msra.mxu1 %v3171_v8  ;;  %v618_v23 = vpack.c.bf16 %v613_v21, %v612_v19 }
 0x10b   : > { %3080 = vmatprep.subr.bf16.mxu1 %v3172_v18 }
 0x10c   : > { %3048 = vmatprep.mubr.bf16.mxu1 %v618_v23 }
 0x10d   : > { %3049 = vmatmul.mubr.bf16.gmra.mrb[4].mxu1 %v619_v22 }
 0x10e   : > { %3081 = vmatpush3.bf16.msra.mxu1 %v3172_v18 }
 0x10f   : > { %3082 = vmatprep.subr.bf16.mxu1 %v3173_v24 }
 0x112   : > { %3083 = vmatpush3.bf16.msra.mxu1 %v3173_v24 }
 0x113   : > { %3084 = vmatprep.subr.bf16.mxu1 %v3174_v25 }
 0x116   : > { %3085 = vmatpush3.bf16.msra.mxu1 %v3174_v25 }
 0x117   : > { %3086 = vmatprep.subr.bf16.mxu1 %v3175_v26 }
 0x119   : > { %v3070_v29 = vpop.f32.mrb[8].mxu0 }
 0x11a   : > { %v882_v30 = vadd.f32 %v3070_v29, %v2872_v27  ;;  %v873_v31 = vpop.f32.mrb[9].mxu0  ;;  %3087 = vmatpush3.bf16.msra.mxu1 %v3175_v26 }
 0x11b   : > { %v874_v32 = vadd.f32 %v2872_v27, %v873_v31  ;;  %v3071_v33 = vpop.f32.mrb[10].mxu0  ;;  %3088 = vmatprep.subr.bf16.mxu1 %v3176_v28 }
 0x11c   : > { %v914_v35 = vmul.f32 0.1, %v882_v30  ;;  %v885_v36 = vadd.f32 %v3071_v33, %v2872_v27  ;;  %v876_v37 = vpop.f32.mrb[11].mxu0  ;;  %vm906_vm8 = vcmp.ge.f32.partialorder %v882_v30, 0.0 }
 0x11d   : > { %v912_v38 = vmul.f32 0.1, %v874_v32  ;;  %v877_v39 = vadd.f32 %v2872_v27, %v876_v37  ;;  %vm904_vm9 = vcmp.ge.f32.partialorder %v874_v32, 0.0 }
 0x11e   : > { %vm907_vm10 = vcmp.ge.f32.partialorder %v885_v36, 0.0  ;;  %v915_v40 = vmul.f32 0.1, %v885_v36  ;;  %3089 = vmatpush3.bf16.msra.mxu1 %v3176_v28  ;;  %v922_v42 = vsel %vm906_vm8, %v882_v30, %v914_v35 }
 0x11f   : > { %vm905_vm11 = vcmp.ge.f32.partialorder %v877_v39, 0.0  ;;  %v913_v41 = vmul.f32 0.1, %v877_v39  ;;  %3090 = vmatprep.subr.bf16.mxu1 %v3177_v34  ;;  %v920_v46 = vsel %vm904_vm9, %v874_v32, %v912_v38 }
 0x120   : > { %v923_v43 = vsel %vm907_vm10, %v885_v36, %v915_v40 }
 0x121   : > { %v929_v44 = vpack.c.bf16 %v923_v43, %v922_v42  ;;  %v3074_v45 = vpop.f32.mrb[12].mxu0  ;;  %v921_v47 = vsel %vm905_vm11, %v877_v39, %v913_v41 }
 0x122   : > { %v898_v48 = vadd.f32 %v3074_v45, %v2872_v27  ;;  %v889_v49 = vpop.f32.mrb[13].mxu0  ;;  %3091 = vmatpush3.bf16.msra.mxu1 %v3177_v34  ;;  %v928_v50 = vpack.c.bf16 %v921_v47, %v920_v46 }
 0x123   : > { %v890_v51 = vadd.f32 %v2872_v27, %v889_v49  ;;  %v3075_v52 = vpop.f32.mrb[14].mxu0 }
 0x124   : > { %v918_v53 = vmul.f32 0.1, %v898_v48  ;;  %v901_v54 = vadd.f32 %v3075_v52, %v2872_v27  ;;  %v892_v55 = vpop.f32.mrb[15].mxu0  ;;  %3092 = vmatprep.mubr.bf16.mxu1 %v928_v50  ;;  %vm910_vm12 = vcmp.ge.f32.partialorder %v898_v48, 0.0 }
 0x125   : > { %v916_v56 = vmul.f32 0.1, %v890_v51  ;;  %v893_v57 = vadd.f32 %v2872_v27, %v892_v55  ;;  %3093 = vmatmul.mubr.bf16.vlgmr.msra.gmra.mrb[8].mxu1 %v929_v44  ;;  %vm908_vm13 = vcmp.ge.f32.partialorder %v890_v51, 0.0 }
 0x126   : > { %vm911_vm14 = vcmp.ge.f32.partialorder %v901_v54, 0.0  ;;  %v919_v58 = vmul.f32 0.1, %v901_v54  ;;  %v926_v60 = vsel %vm910_vm12, %v898_v48, %v918_v53 }
 0x127   : > { %vm909_vm15 = vcmp.ge.f32.partialorder %v893_v57, 0.0  ;;  %v917_v59 = vmul.f32 0.1, %v893_v57  ;;  %v924_v62 = vsel %vm908_vm13, %v890_v51, %v916_v56 }
 0x128   : > { %v927_v61 = vsel %vm911_vm14, %v901_v54, %v919_v58  ;;  %v3219_v54 = vmov 683565275   ;;  %v3220_v58 = vmov 2475754826  }
 0x129   : > { %v925_v63 = vsel %vm909_vm15, %v893_v57, %v917_v59  ;;  %v931_v0 = vpack.c.bf16 %v927_v61, %v926_v60  ;;  %v3221_v60 = vmov 2131351028  }
 0x12a   : > { %v930_v1 = vpack.c.bf16 %v925_v63, %v924_v62  ;;  %v3222_v62 = vmov 2102212464  }
 0x12c   : > { %3096 = vmatprep.mubr.bf16.mxu1 %v930_v1 }
 0x12d   : > { %3097 = vmatmul.mubr.bf16.gmra.mrb[12].mxu1 %v931_v0  ;;  %v3223_v0 = vmov 920167782  }
 0x1d8   : > { %v3425_v2 = vpop.f32.mrb[0].mxu1 }
 0x1d9   : > { %v3427_v3 = vpop.f32.mrb[1].mxu1 }
 0x1da   : > { %v3429_v4 = vpop.f32.mrb[2].mxu1 }
 0x1db   : > { %v711_v6 = vpop.f32.mrb[3].mxu1 }
 0x1dc   : > { %v3437_v7 = vadd.f32 %v3434_v5, %v711_v6 }
 0x1e0   : > { %v3050_v8 = vpop.f32.mrb[4].mxu1 }
 0x1e1   : > { %v3440_v9 = vadd.f32 %v3050_v8, %v3434_v5  ;;  %v724_v10 = vpop.f32.mrb[5].mxu1 }
 0x1e2   : > { %v3443_v11 = vadd.f32 %v3434_v5, %v724_v10  ;;  %v3051_v12 = vpop.f32.mrb[6].mxu1 }
 0x1e3   : > { %v3446_v13 = vadd.f32 %v3051_v12, %v3434_v5  ;;  %v727_v14 = vpop.f32.mrb[7].mxu1 }
 0x1e4   : > { %v3449_v15 = vadd.f32 %v3434_v5, %v727_v14 }
 0x1f8   : > { %v3094_v17 = vpop.f32.mrb[8].mxu1 }
 0x1f9   : > { %v3457_v18 = vadd.f32 %v3094_v17, %v3454_v16  ;;  %v1020_v19 = vpop.f32.mrb[9].mxu1  ;;  %v3224_v17 = vmov 1326507024  }
 0x1fa   : > { %v3460_v20 = vadd.f32 %v3454_v16, %v1020_v19  ;;  %v3095_v21 = vpop.f32.mrb[10].mxu1 }
 0x1fb   : > { %v1257_v22 = vand.u32 2147483647, %v3457_v18  ;;  %v1260_v23 = vand.u32 2139095040, %v3457_v18  ;;  %v1023_v24 = vpop.f32.mrb[11].mxu1  ;;  %v3467_v28 = vadd.f32 %v3095_v21, %v3454_v16  ;;  %vm1259_vm14 = vcmp.lt.s32.totalorder %v3457_v18, 0 }
 0x1fc   : > { %v1051_v25 = vand.u32 2147483647, %v3460_v20  ;;  %v1054_v26 = vand.u32 2139095040, %v3460_v20  ;;  %v3481_v48 = vadd.f32 %v3454_v16, %v1023_v24  ;;  %vm1053_vm15 = vcmp.lt.s32.totalorder %v3460_v20, 0 }
 0x1fd   : > { %v1261_v27 = vshrl.u32 %v1260_v23, 23  ;;  %v1264_v29 = vand.u32 8388607, %v1257_v22  ;;  %v1363_v34 = vand.u32 2139095040, %v3467_v28  ;;  %v1360_v52 = vand.u32 2147483647, %v3467_v28 }
 0x1fe   : > { %v1055_v30 = vshrl.u32 %v1054_v26, 23  ;;  %v1058_v31 = vand.u32 8388607, %v1051_v25  ;;  %vm3566_vm13 = vcmp.le.f32.partialorder %v1257_v22, 0.7853982 }
 0x1ff   : > { %v2898_v32 = vadd.s32 4294967169, %v1261_v27  ;;  %v1265_v37 = vor.u32 8388608, %v1264_v29  ;;  %v1364_v40 = vshrl.u32 %v1363_v34, 23 }
 0x200   : > { %v2890_v33 = vadd.s32 4294967169, %v1055_v30  ;;  %v3474_v35 = vpop.f32.mrb[12].mxu1  ;;  %v1059_v38 = vor.u32 8388608, %v1058_v31 }
 0x201   : > { %v1267_v36 = vadd.s32 1, %v2898_v32  ;;  %v3476_v41 = vpop.f32.mrb[13].mxu1  ;;  %v2902_v44 = vadd.s32 4294967169, %v1364_v40  ;;  %v3483_v49 = vshll.u32 %v1265_v37, 8 }
 0x202   : > { %v1061_v39 = vadd.s32 1, %v2890_v33  ;;  %v3478_v42 = vpop.f32.mrb[14].mxu1  ;;  %v3487_v51 = vshll.u32 %v1059_v38, 8 }
 0x203   : > { %vm1268_vm0 = vcmp.gt.s32.totalorder %v1267_v36, 0  ;;  %v3491_v57 = vadd.s32 1, %v2902_v44 }
 0x204   : > { %v1269_v43 = vsel %vm1268_vm0, %v1267_v36, 0  ;;  %vm1062_vm1 = vcmp.gt.s32.totalorder %v1061_v39, 0 }
 0x205   : > { %v1270_v45 = vshrl.u32 %v1269_v43, 5  ;;  %v1271_v46 = vand.u32 31, %v1269_v43  ;;  %v1063_v47 = vsel %vm1062_vm1, %v1061_v39, 0  ;;  %vm1371_vm11 = vcmp.gt.s32.totalorder %v3491_v57, 0 }
 0x206   : > { %v3485_v50 = vshrl.u32 %v1063_v47, 5  ;;  %v1065_v56 = vand.u32 31, %v1063_v47  ;;  %vm3605_vm1 = vcmp.le.f32.partialorder %v1051_v25, 0.7853982 }
 0x207   : > { %v1272_v53 = vsub.s32 32, %v1271_v46  ;;  %v1274_v55 = vshll.u32 %v3219_v54, %v1271_v46  ;;  %v1277_v59 = vshll.u32 %v3220_v58, %v1271_v46  ;;  %v1280_v61 = vshll.u32 %v3221_v60, %v1271_v46 }
 0x208   : > { %v1283_v63 = vshll.u32 %v3222_v62, %v1271_v46  ;;  %v1286_v1 = vshll.u32 %v3223_v0, %v1271_v46  ;;  %vm1289_vm2 = vcmp.lt.s32.totalorder %v1270_v45, 1  ;;  %vm1290_vm3 = vcmp.lt.s32.totalorder %v1270_v45, 2 }
 0x209   : > { %v1275_v6 = vshrl.u32 %v3220_v58, %v1272_v53  ;;  %v1278_v8 = vshrl.u32 %v3221_v60, %v1272_v53  ;;  %v1281_v10 = vshrl.u32 %v3222_v62, %v1272_v53  ;;  %v1273_v12 = vshrl.u32 %v3219_v54, %v1272_v53 }
 0x20a   : > { %v1284_v14 = vshrl.u32 %v3223_v0, %v1272_v53  ;;  %v1287_v19 = vshrl.u32 %v3224_v17, %v1272_v53  ;;  %v1066_v26 = vsub.s32 32, %v1065_v56  ;;  %vm1291_vm4 = vcmp.lt.s32.totalorder %v1270_v45, 3 }
 0x20b   : > { %v1276_v21 = vor.u32 %v1275_v6, %v1274_v55  ;;  %v1279_v23 = vor.u32 %v1278_v8, %v1277_v59  ;;  %v1282_v24 = vor.u32 %v1281_v10, %v1280_v61  ;;  %vm1292_vm5 = vcmp.lt.s32.totalorder %v1270_v45, 4  ;;  %v3513_v59 = vpop.f32.mrb[15].mxu1 }
 0x20c   : > { %v1285_v27 = vor.u32 %v1284_v14, %v1283_v63  ;;  %v1288_v29 = vor.u32 %v1287_v19, %v1286_v1  ;;  %v1068_v38 = vshll.u32 %v3219_v54, %v1065_v56  ;;  %v1069_v43 = vshrl.u32 %v3220_v58, %v1066_v26 }
 0x20d   : > { %v1293_v30 = vsel %vm1289_vm2, %v1273_v12, %v1276_v21  ;;  %v1294_v31 = vsel %vm1292_vm5, %v1282_v24, 2102212464  ;;  %v1297_v32 = vsel %vm1289_vm2, %v1276_v21, %v1279_v23  ;;  %v1301_v33 = vsel %vm1289_vm2, %v1279_v23, %v1282_v24 }
 0x20e   : > { %v1295_v34 = vsel %vm1291_vm4, %v1279_v23, %v1294_v31  ;;  %v1298_v36 = vsel %vm1292_vm5, %v1285_v27, 920167782  ;;  %v1302_v37 = vsel %vm1292_vm5, %v1288_v29, 1326507024  ;;  %v1071_v44 = vshll.u32 %v3220_v58, %v1065_v56 }
 0x20f   : > { %v1299_v39 = vsel %vm1291_vm4, %v1282_v24, %v1298_v36  ;;  %v1303_v40 = vsel %vm1291_vm4, %v1285_v27, %v1302_v37  ;;  %v1296_v46 = vsel %vm1290_vm3, %v1293_v30, %v1295_v34  ;;  %v1072_v55 = vshrl.u32 %v3221_v60, %v1066_v26 }
 0x210   : > { %v1300_v47 = vsel %vm1290_vm3, %v1297_v32, %v1299_v39  ;;  %v1304_v53 = vsel %vm1290_vm3, %v1301_v33, %v1303_v40  ;;  %v1070_v8 = vor.u32 %v1069_v43, %v1068_v38  ;;  %v1074_v12 = vshll.u32 %v3221_v60, %v1065_v56 }
 0x211   : > { %v3516_v61 = vmul.u32.u64.low %v3483_v49, %v1304_v53  ;;  %v3517_v63 = vmul.u32.u64.high %v3483_v49, %v1304_v53, %v3516_v61  ;;  %v3520_v1 = vmul.u32.u64.low %v3483_v49, %v1300_v47  ;;  %v3521_v6 = vmul.u32.u64.high %v3483_v49, %v1300_v47, %v3520_v1 }
 0x212   : > { %v1073_v10 = vor.u32 %v1072_v55, %v1071_v44  ;;  %v1075_v45 = vshrl.u32 %v3222_v62, %v1066_v26  ;;  %v1067_v14 = vshrl.u32 %v3219_v54, %v1066_v26  ;;  %v1077_v19 = vshll.u32 %v3222_v62, %v1065_v56 }
 0x213   : > { %v1078_v21 = vshrl.u32 %v3223_v0, %v1066_v26  ;;  %v1081_v23 = vshrl.u32 %v3224_v17, %v1066_v26  ;;  %v1312_v24 = vmul.u32 %v3483_v49, %v1296_v46  ;;  %v1080_v29 = vshll.u32 %v3223_v0, %v1065_v56 }
 0x214   : > { %v1076_v27 = vor.u32 %v1075_v45, %v1074_v12  ;;  %vm1083_vm6 = vcmp.lt.s32.totalorder %v3485_v50, 1  ;;  %vm1314_vm7 = vc.u32 %v3517_v63, %v3520_v1  ;;  %v1315_v30 = vadd.s32 1, %v3521_v6 }
 0x215   : > { %v1079_v31 = vor.u32 %v1078_v21, %v1077_v19  ;;  %vm1084_vm8 = vcmp.lt.s32.totalorder %v3485_v50, 2  ;;  %v1082_v32 = vor.u32 %v1081_v23, %v1080_v29  ;;  %vm1085_vm9 = vcmp.lt.s32.totalorder %v3485_v50, 3 }
 0x216   : > { %vm1086_vm10 = vcmp.lt.s32.totalorder %v3485_v50, 4  ;;  %v1091_v26 = vsel %vm1083_vm6, %v1070_v8, %v1073_v10  ;;  %v1316_v49 = vsel %vm1314_vm7, %v1315_v30, %v3521_v6  ;;  %v1095_v34 = vsel %vm1083_vm6, %v1073_v10, %v1076_v27 }
 0x217   : > { %v1088_v33 = vsel %vm1086_vm10, %v1076_v27, 2102212464  ;;  %v1092_v56 = vsel %vm1086_vm10, %v1079_v31, 920167782  ;;  %v1317_v36 = vadd.s32 %v1316_v49, %v1312_v24  ;;  %v1087_v37 = vsel %vm1083_vm6, %v1067_v14, %v1070_v8 }
 0x218   : > { %v1093_v38 = vsel %vm1085_vm9, %v1076_v27, %v1092_v56  ;;  %v1096_v39 = vsel %vm1086_vm10, %v1082_v32, 1326507024  ;;  %v1089_v40 = vsel %vm1085_vm9, %v1073_v10, %v1088_v33  ;;  %v1372_v12 = vsel %vm1371_vm11, %v3491_v57, 0 }
 0x219   : > { %v1094_v43 = vsel %vm1084_vm8, %v1091_v26, %v1093_v38  ;;  %v1097_v44 = vsel %vm1085_vm9, %v1079_v31, %v1096_v39  ;;  %v1318_v46 = vadd.s32 536870912, %v1317_v36  ;;  %v1090_v10 = vsel %vm1084_vm8, %v1087_v37, %v1089_v40 }
 0x21a   : > { %v1098_v47 = vsel %vm1084_vm8, %v1095_v34, %v1097_v44  ;;  %v3546_v53 = vmul.u32.u64.low %v3487_v51, %v1094_v43  ;;  %v3547_v55 = vmul.u32.u64.high %v3487_v51, %v1094_v43, %v3546_v53  ;;  %v1367_v45 = vand.u32 8388607, %v1360_v52 }
 0x21b   : > { %v3550_v61 = vmul.u32.u64.low %v3487_v51, %v1098_v47  ;;  %v3551_v6 = vmul.u32.u64.high %v3487_v51, %v1098_v47, %v3550_v61  ;;  %v1319_v8 = vshrl.u32 %v1318_v46, 30  ;;  %v1157_v21 = vand.u32 2139095040, %v3481_v48 }
 0x21c   : > { %v1109_v19 = vadd.s32 1, %v3547_v55  ;;  %v1106_v23 = vmul.u32 %v3487_v51, %v1090_v10  ;;  %v1374_v24 = vand.u32 31, %v1372_v12  ;;  %v1368_v30 = vor.u32 8388608, %v1367_v45 }
 0x21d   : > { %v1320_v14 = vshll.u32 %v1319_v8, 30  ;;  %vm1108_vm12 = vc.u32 %v3551_v6, %v3546_v53  ;;  %v4260_v57 = vand.u32 2147483647, %v3481_v48  ;;  %v1158_v32 = vshrl.u32 %v1157_v21, 23 }
 0x21e   : > { %v1110_v29 = vsel %vm1108_vm12, %v1109_v19, %v3547_v55  ;;  %v1343_v26 = vsub.s32 4, %v1319_v8  ;;  %v1375_v33 = vsub.s32 32, %v1374_v24  ;;  %v1313_v34 = vadd.s32 %v3520_v1, %v3517_v63 }
 0x21f   : > { %v1321_v27 = vsub.s32 %v1317_v36, %v1320_v14  ;;  %v1111_v50 = vadd.s32 %v1110_v29, %v1106_v23  ;;  %v3573_v37 = vshrl.u32 %v1372_v12, 5  ;;  %v3575_v38 = vshll.u32 %v1368_v30, 8 }
 0x220   : > { %v3578_v40 = vadd.s32 %v3546_v53, %v3551_v6  ;;  %v3580_v43 = vadd.s32 4294967169, %v1158_v32  ;;  %v3584_v22 = vand.u32 8388607, %v4260_v57  ;;  %v1344_v44 = vsel %vm1259_vm14, %v1343_v26, %v1319_v8 }
 0x221   : > { %v1323_v31 = vsub.s32 0, %v1321_v27  ;;  %v1112_v49 = vadd.s32 536870912, %v1111_v50  ;;  %v1377_v1 = vshll.u32 %v3219_v54, %v1374_v24  ;;  %v1378_v46 = vshrl.u32 %v3220_v58, %v1375_v33 }
 0x222   : > { %v1376_v53 = vshrl.u32 %v3219_v54, %v1375_v33  ;;  %v1380_v55 = vshll.u32 %v3220_v58, %v1374_v24  ;;  %v1387_v61 = vshrl.u32 %v3223_v0, %v1375_v33  ;;  %v1381_v10 = vshrl.u32 %v3221_v60, %v1375_v33 }
 0x223   : > { %v2899_v51 = vmin.u32 %v1323_v31, %v1321_v27  ;;  %v1113_v36 = vshrl.u32 %v1112_v49, 30  ;;  %v1384_v8 = vshrl.u32 %v3222_v62, %v1375_v33  ;;  %v1390_v12 = vshrl.u32 %v3224_v17, %v1375_v33 }
 0x224   : > { %v3601_v45 = vsel %vm3566_vm13, 0, %v1344_v44  ;;  %v1383_v19 = vshll.u32 %v3221_v60, %v1374_v24  ;;  %v1386_v21 = vshll.u32 %v3222_v62, %v1374_v24  ;;  %v1389_v30 = vshll.u32 %v3223_v0, %v1374_v24 }
 0x225   : > { %v1325_v39 = vclz %v2899_v51  ;;  %v1114_v63 = vshll.u32 %v1113_v36, 30  ;;  %v1137_v26 = vsub.s32 4, %v1113_v36  ;;  %v1382_v25 = vor.u32 %v1381_v10, %v1380_v55 }
 0x226   : > { %v1388_v49 = vor.u32 %v1387_v61, %v1386_v21  ;;  %v1385_v51 = vor.u32 %v1384_v8, %v1383_v19  ;;  %vm1392_vm2 = vcmp.lt.s32.totalorder %v3573_v37, 1  ;;  %vm1393_vm3 = vcmp.lt.s32.totalorder %v3573_v37, 2 }
 0x227   : > { %v2900_v47 = vadd.s32 4294967294, %v1325_v39  ;;  %v3594_v6 = vsub.s32 %v1111_v50, %v1114_v63  ;;  %v1379_v50 = vor.u32 %v1378_v46, %v1377_v1  ;;  %v1391_v39 = vor.u32 %v1390_v12, %v1389_v30 }
 0x228   : > { %vm1394_vm4 = vcmp.lt.s32.totalorder %v3573_v37, 3  ;;  %vm1395_vm5 = vcmp.lt.s32.totalorder %v3573_v37, 4  ;;  %v1138_v46 = vsel %vm1053_vm15, %v1137_v26, %v1113_v36  ;;  %v1162_v37 = vor.u32 8388608, %v3584_v22 }
 0x229   : > { %vm2901_vm0 = vcmp.lt.s32.totalorder %v2900_v47, 0  ;;  %v1117_v29 = vsub.s32 0, %v3594_v6  ;;  %v1401_v55 = vsel %vm1395_vm5, %v1388_v49, 920167782  ;;  %v1396_v10 = vsel %vm1392_vm2, %v1376_v53, %v1379_v50 }
 0x22a   : > { %v1328_v23 = vsel %vm2901_vm0, 0, %v2900_v47  ;;  %v1397_v12 = vsel %vm1395_vm5, %v1385_v51, 2102212464  ;;  %v1402_v19 = vsel %vm1394_vm4, %v1385_v51, %v1401_v55  ;;  %v1405_v21 = vsel %vm1395_vm5, %v1391_v39, 1326507024 }
 0x22b   : > { %v1329_v31 = vsub.s32 32, %v1328_v23  ;;  %v1333_v32 = vsub.s32 4294967266, %v1328_v23  ;;  %v2891_v33 = vmin.u32 %v1117_v29, %v3594_v6  ;;  %v1330_v44 = vshll.u32 %v1321_v27, %v1328_v23 }
 0x22c   : > { %v1400_v27 = vsel %vm1392_vm2, %v1379_v50, %v1382_v25  ;;  %v1140_v29 = vsel %vm3605_vm1, 0, %v1138_v46  ;;  %v1398_v26 = vsel %vm1394_vm4, %v1382_v25, %v1397_v12  ;;  %v2192_v46 = vadd.s32 3, %v3601_v45 }
 0x22d   : > { %v1331_v63 = vshrl.u32 %v1313_v34, %v1329_v31  ;;  %v1334_v57 = vadd.s32 127, %v1333_v32  ;;  %v1119_v47 = vclz %v2891_v33  ;;  %v1404_v34 = vsel %vm1392_vm2, %v1382_v25, %v1385_v51 }
 0x22e   : > { %v1403_v53 = vsel %vm1393_vm3, %v1400_v27, %v1402_v19  ;;  %v1164_v33 = vadd.s32 1, %v3580_v43  ;;  %v3646_v25 = vadd.f32 %v3425_v2, %v3434_v5  ;;  %v3669_v56 = vadd.f32 %v3434_v5, %v3427_v3 }
 0x22f   : > { %v1332_v24 = vor.u32 %v1331_v63, %v1330_v44  ;;  %v1335_v1 = vshll.u32 %v1334_v57, 23  ;;  %v2892_v61 = vadd.s32 4294967294, %v1119_v47  ;;  %v1406_v57 = vsel %vm1394_vm4, %v1388_v49, %v1405_v21 }
 0x230   : > { %v1407_v50 = vsel %vm1393_vm3, %v1404_v34, %v1406_v57  ;;  %vm1165_vm7 = vcmp.gt.s32.totalorder %v1164_v33, 0  ;;  %v3654_v34 = vand.u32 3, %v3601_v45  ;;  %v3675_v22 = vadd.f32 %v3474_v35, %v3454_v16 }
 0x231   : > { %v1336_v8 = vor.u32 4788187, %v1335_v1  ;;  %v1339_v23 = vcvt.s32.f32 %v1332_v24  ;;  %vm2893_vm6 = vcmp.lt.s32.totalorder %v2892_v61, 0  ;;  %vm1362_vm0 = vcmp.lt.s32.totalorder %v3467_v28, 0 }
 0x232   : > { %v1122_v30 = vsel %vm2893_vm6, 0, %v2892_v61  ;;  %v3635_v49 = vmul.u32.u64.low %v3575_v38, %v1407_v50  ;;  %v3636_v44 = vmul.u32.u64.high %v3575_v38, %v1407_v50, %v3635_v49  ;;  %v1399_v61 = vsel %vm1393_vm3, %v1396_v10, %v1398_v26 }
 0x233   : > { %v1337_v36 = vand.u32 2147483647, %v1336_v8  ;;  %v1123_v31 = vsub.s32 32, %v1122_v30  ;;  %v1127_v32 = vsub.s32 4294967266, %v1122_v30  ;;  %v1124_v39 = vshll.u32 %v3594_v6, %v1122_v30 }
 0x234   : > { %v3640_v24 = vmul.u32.u64.low %v3575_v38, %v1403_v53  ;;  %v3641_v1 = vmul.u32.u64.high %v3575_v38, %v1403_v53, %v3640_v24  ;;  %v1984_v8 = vadd.s32 3, %v1140_v29  ;;  %v3663_v10 = vand.u32 3, %v2192_v46 }
 0x235   : > { %v1340_v51 = vmul.f32 %v1339_v23, %v1337_v36  ;;  %v1125_v63 = vshrl.u32 %v3578_v40, %v1123_v31  ;;  %v1128_v47 = vadd.s32 127, %v1127_v32  ;;  %v1166_v40 = vsel %vm1165_vm7, %v1164_v33, 0 }
 0x236   : > { %vm1417_vm8 = vc.u32 %v3636_v44, %v3640_v24  ;;  %v1418_v19 = vadd.s32 1, %v3641_v1  ;;  %v1415_v21 = vmul.u32 %v3575_v38, %v1399_v61  ;;  %v1168_v45 = vand.u32 31, %v1166_v40 }
 0x237   : > { %v1341_v43 = vxor.u32 2147483648, %v1340_v51  ;;  %v1126_v6 = vor.u32 %v1125_v63, %v1124_v39  ;;  %v1129_v55 = vshll.u32 %v1128_v47, 23  ;;  %v3677_v31 = vand.u32 3, %v1140_v29 }
 0x238   : > { %v1419_v36 = vsel %vm1417_vm8, %v1418_v19, %v3641_v1  ;;  %v3671_v53 = vsub.s32 32, %v1168_v45  ;;  %v3679_v38 = vand.u32 3, %v1984_v8  ;;  %v3681_v32 = vshll.u32 %v1162_v37, 8 }
 0x239   : > { %v1342_v27 = vsel %vm1259_vm14, %v1341_v43, %v1340_v51  ;;  %v1130_v12 = vor.u32 4788187, %v1129_v55  ;;  %v1133_v57 = vcvt.s32.f32 %v1126_v6  ;;  %v1420_v30 = vadd.s32 %v1419_v36, %v1415_v21 }
 0x23a   : > { %v1345_v2 = vsel %vm3566_vm13, %v3457_v18, %v1342_v27  ;;  %vm1355_vm9 = vcmp.eq.s32.totalorder %v3654_v34, 2  ;;  %vm2198_vm10 = vcmp.eq.s32.totalorder %v3663_v10, 2  ;;  %v3685_v26 = vshrl.u32 %v1166_v40, 5 }
 0x23b   : > { %3178 = vcosq.f32 %v1345_v2  ;;  %v1131_v23 = vand.u32 2147483647, %v1130_v12  ;;  %v1421_v3 = vadd.s32 536870912, %v1420_v30  ;;  %v1172_v33 = vshrl.u32 %v3220_v58, %v3671_v53 }
 0x23c   : > { %3180 = vsinq.f32 %v1345_v2  ;;  %v1180_v35 = vshll.u32 %v3222_v62, %v1168_v45  ;;  %vm1352_vm11 = vcmp.eq.s32.totalorder %v3654_v34, 0  ;;  %vm2195_vm12 = vcmp.eq.s32.totalorder %v3663_v10, 0 }
 0x23d   : > { %v1134_v50 = vmul.f32 %v1133_v57, %v1131_v23  ;;  %v1175_v51 = vshrl.u32 %v3221_v60, %v3671_v53  ;;  %v1178_v39 = vshrl.u32 %v3222_v62, %v3671_v53  ;;  %v1181_v49 = vshrl.u32 %v3223_v0, %v3671_v53 }
 0x23e   : > { %vm1351_vm13 = vcmp.lt.s32.totalorder %v3654_v34, 2  ;;  %vm2194_vm14 = vcmp.lt.s32.totalorder %v3663_v10, 2  ;;  %v1422_v63 = vshrl.u32 %v1421_v3, 30  ;;  %v1171_v47 = vshll.u32 %v3219_v54, %v1168_v45 }
 0x23f   : > { %v1135_v29 = vxor.u32 2147483648, %v1134_v50  ;;  %v1669_v1 = vand.u32 2147483647, %v3675_v22  ;;  %v1672_v43 = vand.u32 2139095040, %v3675_v22  ;;  %vm1349_vm2 = vweird.f32 %v3457_v18 }
 0x240   : > { %v1174_v6 = vshll.u32 %v3220_v58, %v1168_v45  ;;  %v1177_v55 = vshll.u32 %v3221_v60, %v1168_v45  ;;  %v1182_v61 = vor.u32 %v1181_v49, %v1180_v35  ;;  %v1423_v27 = vshll.u32 %v1422_v63, 30 }
 0x241   : > { %v1136_v46 = vsel %vm1053_vm15, %v1135_v29, %v1134_v50  ;;  %v1173_v8 = vor.u32 %v1172_v33, %v1171_v47  ;;  %v1184_v2 = vshrl.u32 %v3224_v17, %v3671_v53  ;;  %vm1189_vm3 = vcmp.lt.s32.totalorder %v3685_v26, 4 }
 0x242   : > { %v1139_v40 = vsel %vm3605_vm1, %v3460_v20, %v1136_v46  ;;  %v1176_v12 = vor.u32 %v1175_v51, %v1174_v6  ;;  %v1179_v19 = vor.u32 %v1178_v39, %v1177_v55  ;;  %vm3717_vm15 = vcmp.le.f32.partialorder %v1360_v52, 0.7853982 }
 0x243   : > { %3182 = vcosq.f32 %v1139_v40  ;;  %v3721_v14 = vsub.s32 %v1420_v30, %v1423_v27  ;;  %v1183_v23 = vshll.u32 %v3223_v0, %v1168_v45  ;;  %v1195_v57 = vsel %vm1189_vm3, %v1182_v61, 920167782 }
 0x244   : > { %3184 = vsinq.f32 %v1139_v40  ;;  %v1446_v3 = vsub.s32 4, %v1422_v63  ;;  %vm1186_vm1 = vcmp.lt.s32.totalorder %v3685_v26, 1  ;;  %vm1187_vm4 = vcmp.lt.s32.totalorder %v3685_v26, 2 }
 0x245   : > { %v3179_v37 = vpop.eup %3178  ;;  %v1426_v52 = vsub.s32 0, %v3721_v14  ;;  %v1185_v35 = vor.u32 %v1184_v2, %v1183_v23  ;;  %vm1188_vm5 = vcmp.lt.s32.totalorder %v3685_v26, 3  ;;  %vm1149_vm6 = vcmp.eq.s32.totalorder %v3677_v31, 2 }
 0x246   : > { %v3181_v36 = vpop.eup %3180  ;;  %v1356_v50 = vxor.u32 2147483648, %v3179_v37  ;;  %vm1990_vm7 = vcmp.eq.s32.totalorder %v3679_v38, 2  ;;  %v1194_v29 = vsel %vm1186_vm1, %v1173_v8, %v1176_v12  ;;  %v1196_v51 = vsel %vm1188_vm5, %v1179_v19, %v1195_v57 }
 0x247   : > { %v1353_v33 = vxor.u32 2147483648, %v3181_v36  ;;  %vm1146_vm8 = vcmp.eq.s32.totalorder %v3677_v31, 0  ;;  %v2903_v47 = vmin.u32 %v1426_v52, %v3721_v14  ;;  %v1170_v46 = vshrl.u32 %v3219_v54, %v3671_v53 }
 0x248   : > { %v1357_v30 = vsel %vm1355_vm9, %v1356_v50, %v3181_v36  ;;  %v2200_v45 = vsel %vm2198_vm10, %v1356_v50, %v3181_v36  ;;  %vm1987_vm9 = vcmp.eq.s32.totalorder %v3679_v38, 0  ;;  %vm1145_vm10 = vcmp.lt.s32.totalorder %v3677_v31, 2 }
 0x249   : > { %v1354_v39 = vsel %vm1352_vm11, %v3179_v37, %v1353_v33  ;;  %v2197_v49 = vsel %vm2195_vm12, %v3179_v37, %v1353_v33  ;;  %vm1986_vm11 = vcmp.lt.s32.totalorder %v3679_v38, 2  ;;  %v1447_v40 = vsel %vm1362_vm0, %v1446_v3, %v1422_v63 }
 0x24a   : > { %v1358_v6 = vsel %vm1351_vm13, %v1354_v39, %v1357_v30  ;;  %v2201_v55 = vsel %vm2194_vm14, %v2197_v49, %v2200_v45  ;;  %v1191_v27 = vsel %vm1189_vm3, %v1179_v19, 2102212464  ;;  %vm1143_vm12 = vweird.f32 %v3460_v20 }
 0x24b   : > { %v1359_v34 = vsel %vm1349_vm2, nan, %v1358_v6  ;;  %v2202_v10 = vsel %vm1349_vm2, nan, %v2201_v55  ;;  %v1428_v53 = vclz %v2903_v47  ;;  %v1197_v63 = vsel %vm1187_vm4, %v1194_v29, %v1196_v51 }
 0x24c   : > { %v1877_v2 = vmul.f32 %v1359_v34, %v3646_v25  ;;  %v2725_v37 = vmul.f32 %v2202_v10, %v3646_v25  ;;  %v1198_v23 = vsel %vm1186_vm1, %v1176_v12, %v1179_v19  ;;  %v1199_v57 = vsel %vm1189_vm3, %v1185_v35, 1326507024 }
 0x24d   : > { %v1416_v18 = vadd.s32 %v3640_v24, %v3636_v44  ;;  %v2904_v36 = vadd.s32 4294967294, %v1428_v53  ;;  %v1190_v50 = vsel %vm1186_vm1, %v1170_v46, %v1173_v8  ;;  %v1192_v3 = vsel %vm1188_vm5, %v1176_v12, %v1191_v27  ;;  %v3183_v33 = vpop.eup %3182 }
 0x24e   : > { %1885 = vst [vmem:[%s3763_s15 + $0x10] sm:$0xff] %v1877_v2  ;;  %2733 = vst [vmem:[%s3769_s19 + $0x10] sm:$0xff] %v2725_v37  ;;  %v1449_v25 = vsel %vm3717_vm15, 0, %v1447_v40  ;;  %v1200_v19 = vsel %vm1188_vm5, %v1182_v61, %v1199_v57  ;;  %v3797_v52 = vmul.u32.u64.low %v3681_v32, %v1197_v63  ;;  %v3798_v35 = vmul.u32.u64.high %v3681_v32, %v1197_v63, %v3797_v52  ;;  %v3185_v44 = vpop.eup %3184 }
 0x24f   : > { %v1150_v24 = vxor.u32 2147483648, %v3183_v33  ;;  %vm2905_vm13 = vcmp.lt.s32.totalorder %v2904_v36, 0  ;;  %v1201_v8 = vsel %vm1187_vm4, %v1198_v23, %v1200_v19  ;;  %v1673_v12 = vshrl.u32 %v1672_v43, 23 }
 0x250   : > { %v1147_v30 = vxor.u32 2147483648, %v3185_v44  ;;  %v1431_v45 = vsel %vm2905_vm13, 0, %v2904_v36  ;;  %v3805_v29 = vmul.u32.u64.low %v3681_v32, %v1201_v8  ;;  %v3806_v51 = vmul.u32.u64.high %v3681_v32, %v1201_v8, %v3805_v29 }
 0x251   : > { %v1151_v61 = vsel %vm1149_vm6, %v1150_v24, %v3185_v44  ;;  %v1992_v39 = vsel %vm1990_vm7, %v1150_v24, %v3185_v44  ;;  %v1432_v49 = vsub.s32 32, %v1431_v45  ;;  %v1193_v47 = vsel %vm1187_vm4, %v1190_v50, %v1192_v3 }
 0x252   : > { %v1148_v46 = vsel %vm1146_vm8, %v3183_v33, %v1147_v30  ;;  %v1989_v43 = vsel %vm1987_vm9, %v3183_v33, %v1147_v30  ;;  %v1436_v6 = vsub.s32 4294967266, %v1431_v45  ;;  %v1212_v55 = vadd.s32 1, %v3798_v35 }
 0x253   : > { %v1152_v40 = vsel %vm1145_vm10, %v1148_v46, %v1151_v61  ;;  %v1993_v27 = vsel %vm1986_vm11, %v1989_v43, %v1992_v39  ;;  %v1434_v34 = vshrl.u32 %v1416_v18, %v1432_v49  ;;  %v2914_v26 = vadd.s32 4294967169, %v1673_v12 }
 0x254   : > { %v1153_v10 = vsel %vm1143_vm12, nan, %v1152_v40  ;;  %v1994_v53 = vsel %vm1143_vm12, nan, %v1993_v27  ;;  %v1433_v63 = vshll.u32 %v3721_v14, %v1431_v45  ;;  %v1437_v2 = vadd.s32 127, %v1436_v6 }
 0x255   : > { %v1875_v37 = vmul.f32 %v1153_v10, %v3669_v56  ;;  %v2723_v31 = vmul.f32 %v1994_v53, %v3669_v56  ;;  %v1209_v38 = vmul.u32 %v3681_v32, %v1193_v47  ;;  %vm1211_vm14 = vc.u32 %v3806_v51, %v3797_v52 }
 0x256   : > { %v1435_v23 = vor.u32 %v1434_v34, %v1433_v63  ;;  %v1438_v57 = vshll.u32 %v1437_v2, 23  ;;  %v1213_v18 = vsel %vm1211_vm14, %v1212_v55, %v3798_v35  ;;  %v1679_v36 = vadd.s32 1, %v2914_v26 }
 0x257   : > { %1883 = vst [vmem:[%s3763_s15] sm:$0xff] %v1875_v37  ;;  %2731 = vst [vmem:[%s3769_s19] sm:$0xff] %v2723_v31  ;;  %v1214_v20 = vadd.s32 %v1213_v18, %v1209_v38  ;;  %v2296_v14 = vadd.s32 3, %v1449_v25  ;;  %v1676_v56 = vand.u32 8388607, %v1669_v1  ;;  %v3839_v8 = vadd.f32 %v3454_v16, %v3476_v41 }
 0x258   : > { %v1439_v50 = vor.u32 4788187, %v1438_v57  ;;  %vm1680_vm2 = vcmp.gt.s32.totalorder %v1679_v36, 0  ;;  %v1442_v44 = vcvt.s32.f32 %v1435_v23  ;;  %v3843_v35 = vadd.f32 %v3429_v4, %v3434_v5 }
 0x259   : > { %v1215_v3 = vadd.s32 536870912, %v1214_v20  ;;  %v1681_v33 = vsel %vm1680_vm2, %v1679_v36, 0  ;;  %v3845_v45 = vand.u32 3, %v1449_v25  ;;  %v3847_v29 = vand.u32 3, %v2296_v14 }
 0x25a   : > { %v1440_v19 = vand.u32 2147483647, %v1439_v50  ;;  %v1683_v32 = vand.u32 31, %v1681_v33  ;;  %vm1156_vm3 = vcmp.lt.s32.totalorder %v3481_v48, 0  ;;  %v3851_v49 = vadd.s32 %v3797_v52, %v3806_v51 }
 0x25b   : > { %v1216_v24 = vshrl.u32 %v1215_v3, 30  ;;  %v1677_v47 = vor.u32 8388608, %v1676_v56  ;;  %v1466_v25 = vand.u32 2139095040, %v3839_v8  ;;  %v4267_v55 = vand.u32 2147483647, %v3481_v48 }
 0x25c   : > { %v1443_v12 = vmul.f32 %v1442_v44, %v1440_v19  ;;  %v1684_v30 = vsub.s32 32, %v1683_v32  ;;  %v1686_v43 = vshll.u32 %v3219_v54, %v1683_v32  ;;  %v1689_v6 = vshll.u32 %v3220_v58, %v1683_v32 }
 0x25d   : > { %v1217_v61 = vshll.u32 %v1216_v24, 30  ;;  %vm3869_vm1 = vcmp.le.f32.partialorder %v4267_v55, 0.7853982  ;;  %v1240_v34 = vsub.s32 4, %v1216_v24  ;;  %v1692_v26 = vshll.u32 %v3221_v60, %v1683_v32 }
 0x25e   : > { %v1444_v39 = vxor.u32 2147483648, %v1443_v12  ;;  %v1687_v16 = vshrl.u32 %v3220_v58, %v1684_v30  ;;  %v1690_v4 = vshrl.u32 %v3221_v60, %v1684_v30  ;;  %v1693_v5 = vshrl.u32 %v3222_v62, %v1684_v30 }
 0x25f   : > { %v3854_v41 = vsub.s32 %v1214_v20, %v1217_v61  ;;  %v1696_v52 = vshrl.u32 %v3223_v0, %v1684_v30  ;;  %v1682_v10 = vshrl.u32 %v1681_v33, 5  ;;  %v1695_v63 = vshll.u32 %v3222_v62, %v1683_v32 }
 0x260   : > { %v1445_v46 = vsel %vm1362_vm0, %v1444_v39, %v1443_v12  ;;  %v1688_v53 = vor.u32 %v1687_v16, %v1686_v43  ;;  %v1691_v2 = vor.u32 %v1690_v4, %v1689_v6  ;;  %v1694_v37 = vor.u32 %v1693_v5, %v1692_v26 }
 0x261   : > { %v1448_v51 = vsel %vm3717_vm15, %v3467_v28, %v1445_v46  ;;  %v1220_v27 = vsub.s32 0, %v3854_v41  ;;  %v1697_v31 = vor.u32 %v1696_v52, %v1695_v63  ;;  %v1698_v38 = vshll.u32 %v3223_v0, %v1683_v32 }
 0x262   : > { %3186 = vcosq.f32 %v1448_v51  ;;  %v1699_v23 = vshrl.u32 %v3224_v17, %v1684_v30  ;;  %v3879_v57 = vshll.u32 %v1677_v47, 8  ;;  %v1241_v36 = vsel %vm1156_vm3, %v1240_v34, %v1216_v24 }
 0x263   : > { %3188 = vsinq.f32 %v1448_v51  ;;  %v2895_v21 = vmin.u32 %v1220_v27, %v3854_v41  ;;  %v1685_v20 = vshrl.u32 %v3219_v54, %v1684_v30  ;;  %v1467_v50 = vshrl.u32 %v1466_v25, 23 }
 0x264   : > { %vm1458_vm0 = vcmp.eq.s32.totalorder %v3845_v45, 2  ;;  %vm2302_vm15 = vcmp.eq.s32.totalorder %v3847_v29, 2  ;;  %v1700_v14 = vor.u32 %v1699_v23, %v1698_v38  ;;  %vm1701_vm4 = vcmp.lt.s32.totalorder %v1682_v10, 1 }
 0x265   : > { %v1222_v18 = vclz %v2895_v21  ;;  %vm1703_vm5 = vcmp.lt.s32.totalorder %v1682_v10, 3  ;;  %vm1704_vm6 = vcmp.lt.s32.totalorder %v1682_v10, 4  ;;  %vm1455_vm7 = vcmp.eq.s32.totalorder %v3845_v45, 0 }
 0x266   : > { %vm2299_vm8 = vcmp.eq.s32.totalorder %v3847_v29, 0  ;;  %v1705_v33 = vsel %vm1701_vm4, %v1685_v20, %v1688_v53  ;;  %v1706_v19 = vsel %vm1704_vm6, %v1694_v37, 2102212464  ;;  %v1709_v44 = vsel %vm1701_vm4, %v1688_v53, %v1691_v2 }
 0x267   : > { %v2896_v3 = vadd.s32 4294967294, %v1222_v18  ;;  %vm1454_vm9 = vcmp.lt.s32.totalorder %v3845_v45, 2  ;;  %vm2298_vm10 = vcmp.lt.s32.totalorder %v3847_v29, 2  ;;  %v1707_v56 = vsel %vm1703_vm5, %v1691_v2, %v1706_v19 }
 0x268   : > { %v1710_v32 = vsel %vm1704_vm6, %v1697_v31, 920167782  ;;  %v1713_v24 = vsel %vm1701_vm4, %v1691_v2, %v1694_v37  ;;  %v1714_v12 = vsel %vm1704_vm6, %v1700_v14, 1326507024  ;;  %vm1452_vm11 = vweird.f32 %v3467_v28 }
 0x269   : > { %vm2897_vm12 = vcmp.lt.s32.totalorder %v2896_v3, 0  ;;  %vm1702_vm13 = vcmp.lt.s32.totalorder %v1682_v10, 2  ;;  %v1711_v30 = vsel %vm1703_vm5, %v1694_v37, %v1710_v32  ;;  %v1715_v61 = vsel %vm1703_vm5, %v1697_v31, %v1714_v12 }
 0x26a   : > { %v1225_v39 = vsel %vm2897_vm12, 0, %v2896_v3  ;;  %v1243_v47 = vsel %vm3869_vm1, 0, %v1241_v36  ;;  %v1712_v16 = vsel %vm1702_vm13, %v1709_v44, %v1711_v30  ;;  %v1716_v4 = vsel %vm1702_vm13, %v1713_v24, %v1715_v61 }
 0x26b   : > { %v1226_v5 = vsub.s32 32, %v1225_v39  ;;  %v1230_v25 = vsub.s32 4294967266, %v1225_v39  ;;  %v1708_v46 = vsel %vm1702_vm13, %v1705_v33, %v1707_v56  ;;  %v2906_v43 = vadd.s32 4294967169, %v1467_v50 }
 0x26c   : > { %v3187_v6 = vpop.eup %3186  ;;  %v3897_v52 = vmul.u32.u64.low %v3879_v57, %v1716_v4  ;;  %v3898_v51 = vmul.u32.u64.high %v3879_v57, %v1716_v4, %v3897_v52  ;;  %v3901_v55 = vmul.u32.u64.low %v3879_v57, %v1712_v16  ;;  %v3902_v27 = vmul.u32.u64.high %v3879_v57, %v1712_v16, %v3901_v55 }
 0x26d   : > { %v3189_v34 = vpop.eup %3188  ;;  %v1459_v26 = vxor.u32 2147483648, %v3187_v6  ;;  %v1227_v10 = vshll.u32 %v3854_v41, %v1225_v39  ;;  %v1228_v53 = vshrl.u32 %v3851_v49, %v1226_v5  ;;  %v1231_v63 = vadd.s32 127, %v1230_v25 }
 0x26e   : > { %v1456_v21 = vxor.u32 2147483648, %v3189_v34  ;;  %v2088_v2 = vadd.s32 3, %v1243_v47  ;;  %v1463_v37 = vand.u32 2147483647, %v3839_v8  ;;  %v1473_v31 = vadd.s32 1, %v2906_v43 }
 0x26f   : > { %v1460_v38 = vsel %vm1458_vm0, %v1459_v26, %v3189_v34  ;;  %v2304_v23 = vsel %vm2302_vm15, %v1459_v26, %v3189_v34  ;;  %v1229_v18 = vor.u32 %v1228_v53, %v1227_v10  ;;  %v1232_v36 = vshll.u32 %v1231_v63, 23 }
 0x270   : > { %v1457_v20 = vsel %vm1455_vm7, %v3187_v6, %v1456_v21  ;;  %v2301_v49 = vsel %vm2299_vm8, %v3187_v6, %v1456_v21  ;;  %v1724_v41 = vmul.u32 %v3879_v57, %v1708_v46  ;;  %vm1726_vm14 = vc.u32 %v3898_v51, %v3901_v55 }
 0x271   : > { %v1461_v50 = vsel %vm1454_vm9, %v1457_v20, %v1460_v38  ;;  %v2305_v14 = vsel %vm2298_vm10, %v2301_v49, %v2304_v23  ;;  %v1233_v3 = vor.u32 4788187, %v1232_v36  ;;  %v1236_v33 = vcvt.s32.f32 %v1229_v18 }
 0x272   : > { %v1462_v19 = vsel %vm1452_vm11, nan, %v1461_v50  ;;  %v2306_v44 = vsel %vm1452_vm11, nan, %v2305_v14  ;;  %v1727_v57 = vadd.s32 1, %v3902_v27  ;;  %vm1474_vm2 = vcmp.gt.s32.totalorder %v1473_v31, 0  ;;  %v3210_v50 = vld [vmem:[%s4257_s9] ss:$0 sm:$0xff] }
 0x273   : > { %v1878_v56 = vmul.f32 %v1462_v19, %v3843_v35  ;;  %v2726_v45 = vmul.f32 %v2306_v44, %v3843_v35  ;;  %v1234_v32 = vand.u32 2147483647, %v1233_v3  ;;  %v1475_v24 = vsel %vm1474_vm2, %v1473_v31, 0 }
 0x274   : > { %v1728_v29 = vsel %vm1726_vm14, %v1727_v57, %v3902_v27  ;;  %v1477_v12 = vand.u32 31, %v1475_v24  ;;  %v3933_v39 = vand.u32 3, %v1243_v47  ;;  %v3935_v28 = vand.u32 3, %v2088_v2 }
 0x275   : > { %1886 = vst [vmem:[%s3763_s15 + $0x18] sm:$0xff] %v1878_v56  ;;  %2734 = vst [vmem:[%s3769_s19 + $0x18] sm:$0xff] %v2726_v45  ;;  %v1237_v30 = vmul.f32 %v1236_v33, %v1234_v32  ;;  %v1729_v61 = vadd.s32 %v1728_v29, %v1724_v41  ;;  %v1470_v16 = vand.u32 8388607, %v1463_v37  ;;  %v3939_v35 = vshrl.u32 %v1475_v24, 5 }
 0x276   : > { %v1478_v4 = vsub.s32 32, %v1477_v12  ;;  %v1480_v46 = vshll.u32 %v3219_v54, %v1477_v12  ;;  %v1483_v6 = vshll.u32 %v3220_v58, %v1477_v12  ;;  %v1486_v63 = vshll.u32 %v3221_v60, %v1477_v12 }
 0x277   : > { %v1238_v5 = vxor.u32 2147483648, %v1237_v30  ;;  %v1730_v25 = vadd.s32 536870912, %v1729_v61  ;;  %v1489_v21 = vshll.u32 %v3222_v62, %v1477_v12  ;;  %v1492_v2 = vshll.u32 %v3223_v0, %v1477_v12 }
 0x278   : > { %v1481_v43 = vshrl.u32 %v3220_v58, %v1478_v4  ;;  %v1484_v52 = vshrl.u32 %v3221_v60, %v1478_v4  ;;  %v1487_v47 = vshrl.u32 %v3222_v62, %v1478_v4  ;;  %v1490_v26 = vshrl.u32 %v3223_v0, %v1478_v4 }
 0x279   : > { %v1239_v27 = vsel %vm1156_vm3, %v1238_v5, %v1237_v30  ;;  %v1731_v34 = vshrl.u32 %v1730_v25, 30  ;;  %v1493_v10 = vshrl.u32 %v3224_v17, %v1478_v4  ;;  %v1471_v41 = vor.u32 8388608, %v1470_v16 }
 0x27a   : > { %v1242_v53 = vsel %vm3869_vm1, %v3481_v48, %v1239_v27  ;;  %v1482_v38 = vor.u32 %v1481_v43, %v1480_v46  ;;  %v1485_v23 = vor.u32 %v1484_v52, %v1483_v6  ;;  %v1488_v18 = vor.u32 %v1487_v47, %v1486_v63 }
 0x27b   : > { %3190 = vcosq.f32 %v1242_v53  ;;  %v1732_v31 = vshll.u32 %v1731_v34, 30  ;;  %v1491_v36 = vor.u32 %v1490_v26, %v1489_v21  ;;  %v1494_v20 = vor.u32 %v1493_v10, %v1492_v2 }
 0x27c   : > { %3192 = vsinq.f32 %v1242_v53  ;;  %vm1671_vm3 = vcmp.lt.s32.totalorder %v3675_v22, 0  ;;  %vm1252_vm1 = vcmp.eq.s32.totalorder %v3933_v39, 2  ;;  %vm1495_vm0 = vcmp.lt.s32.totalorder %v3939_v35, 1 }
 0x27d   : > { %v3956_v49 = vsub.s32 %v1729_v61, %v1732_v31  ;;  %vm1498_vm15 = vcmp.lt.s32.totalorder %v3939_v35, 4  ;;  %v3967_v14 = vadd.f32 %v3210_v50, %v3478_v42  ;;  %vm1249_vm4 = vcmp.eq.s32.totalorder %v3933_v39, 0 }
 0x27e   : > { %vm2091_vm5 = vcmp.eq.s32.totalorder %v3935_v28, 0  ;;  %v1503_v3 = vsel %vm1495_vm0, %v1482_v38, %v1485_v23  ;;  %v1504_v33 = vsel %vm1498_vm15, %v1491_v36, 920167782  ;;  %v1507_v19 = vsel %vm1495_vm0, %v1485_v23, %v1488_v18 }
 0x27f   : > { %v1735_v40 = vsub.s32 0, %v3956_v49  ;;  %v1508_v44 = vsel %vm1498_vm15, %v1494_v20, 1326507024  ;;  %vm1248_vm6 = vcmp.lt.s32.totalorder %v3933_v39, 2  ;;  %vm2090_vm7 = vcmp.lt.s32.totalorder %v3935_v28, 2 }
 0x280   : > { %v1479_v57 = vshrl.u32 %v3219_v54, %v1478_v4  ;;  %vm1497_vm8 = vcmp.lt.s32.totalorder %v3939_v35, 3  ;;  %v1511_v56 = vshll.u32 %v1471_v41, 8  ;;  %vm1246_vm9 = vweird.f32 %v3481_v48 }
 0x281   : > { %v2915_v42 = vmin.u32 %v1735_v40, %v3956_v49  ;;  %vm1496_vm10 = vcmp.lt.s32.totalorder %v3939_v35, 2  ;;  %v1500_v45 = vsel %vm1498_vm15, %v1488_v18, 2102212464  ;;  %v1505_v32 = vsel %vm1497_vm8, %v1488_v18, %v1504_v33 }
 0x282   : > { %v1509_v24 = vsel %vm1497_vm8, %v1491_v36, %v1508_v44  ;;  %v1755_v12 = vsub.s32 4, %v1731_v34  ;;  %v1506_v30 = vsel %vm1496_vm10, %v1503_v3, %v1505_v32  ;;  %vm2094_vm11 = vcmp.eq.s32.totalorder %v3935_v28, 2 }
 0x283   : > { %v1737_v29 = vclz %v2915_v42  ;;  %v1510_v61 = vsel %vm1496_vm10, %v1507_v19, %v1509_v24  ;;  %vm3999_vm12 = vcmp.le.f32.partialorder %v1669_v1, 0.7853982  ;;  %v1499_v4 = vsel %vm1495_vm0, %v1479_v57, %v1482_v38 }
 0x284   : > { %v1775_v5 = vand.u32 2139095040, %v3967_v14  ;;  %v4007_v25 = vadd.f32 %v3210_v50, %v3513_v59  ;;  %v1501_v6 = vsel %vm1497_vm8, %v1485_v23, %v1500_v45  ;;  %v1725_v59 = vadd.s32 %v3901_v55, %v3898_v51 }
 0x285   : > { %v3191_v46 = vpop.eup %3190  ;;  %v2916_v43 = vadd.s32 4294967294, %v1737_v29  ;;  %v4011_v52 = vmul.u32.u64.low %v1511_v56, %v1510_v61  ;;  %v4012_v47 = vmul.u32.u64.high %v1511_v56, %v1510_v61, %v4011_v52  ;;  %v1756_v21 = vsel %vm1671_vm3, %v1755_v12, %v1731_v34 }
 0x286   : > { %v3193_v1 = vpop.eup %3192  ;;  %v1253_v27 = vxor.u32 2147483648, %v3191_v46  ;;  %v4014_v26 = vmul.u32.u64.low %v1511_v56, %v1506_v30  ;;  %v4015_v10 = vmul.u32.u64.high %v1511_v56, %v1506_v30, %v4014_v26  ;;  %v1776_v53 = vshrl.u32 %v1775_v5, 23 }
 0x287   : > { %v1250_v63 = vxor.u32 2147483648, %v3193_v1  ;;  %vm2917_vm13 = vcmp.lt.s32.totalorder %v2916_v43, 0  ;;  %v1502_v23 = vsel %vm1496_vm10, %v1499_v4, %v1501_v6  ;;  %v1772_v42 = vand.u32 2147483647, %v3967_v14 }
 0x288   : > { %v1254_v2 = vsel %vm1252_vm1, %v1253_v27, %v3193_v1  ;;  %v2096_v31 = vsel %vm2094_vm11, %v1253_v27, %v3193_v1  ;;  %v1740_v38 = vsel %vm2917_vm13, 0, %v2916_v43  ;;  %v2918_v36 = vadd.s32 4294967169, %v1776_v53 }
 0x289   : > { %v1251_v18 = vsel %vm1249_vm4, %v3191_v46, %v1250_v63  ;;  %v2093_v51 = vsel %vm2091_vm5, %v3191_v46, %v1250_v63  ;;  %v1741_v55 = vsub.s32 32, %v1740_v38  ;;  %v1742_v41 = vshll.u32 %v3956_v49, %v1740_v38 }
 0x28a   : > { %v1255_v34 = vsel %vm1248_vm6, %v1251_v18, %v1254_v2  ;;  %v2097_v20 = vsel %vm2090_vm7, %v2093_v51, %v2096_v31  ;;  %v1745_v35 = vsub.s32 4294967266, %v1740_v38  ;;  %vm1520_vm14 = vc.u32 %v4012_v47, %v4014_v26 }
 0x28b   : > { %v1256_v40 = vsel %vm1246_vm9, nan, %v1255_v34  ;;  %v2098_v50 = vsel %vm1246_vm9, nan, %v2097_v20  ;;  %v1743_v3 = vshrl.u32 %v1725_v59, %v1741_v55  ;;  %v1521_v19 = vadd.s32 1, %v4015_v10 }
 0x28c   : > { %v1876_v39 = vmul.f32 %v1256_v40, %v3437_v7  ;;  %v2724_v28 = vmul.f32 %v2098_v50, %v3437_v7  ;;  %v1746_v33 = vadd.s32 127, %v1745_v35  ;;  %v1758_v49 = vsel %vm3999_vm12, 0, %v1756_v21 }
 0x28d   : > { %v1518_v44 = vmul.u32 %v1511_v56, %v1502_v23  ;;  %v1782_v57 = vadd.s32 1, %v2918_v36  ;;  %v1744_v48 = vor.u32 %v1743_v3, %v1742_v41  ;;  %v1522_v32 = vsel %vm1520_vm14, %v1521_v19, %v4015_v10 }
 0x28e   : > { %1884 = vst [vmem:[%s3763_s15 + $0x8] sm:$0xff] %v1876_v39  ;;  %2732 = vst [vmem:[%s3769_s19 + $0x8] sm:$0xff] %v2724_v28  ;;  %v1747_v45 = vshll.u32 %v1746_v33, 23  ;;  %v2608_v7 = vadd.s32 3, %v1758_v49  ;;  %v1779_v61 = vand.u32 8388607, %v1772_v42  ;;  %vm1761_vm11 = vweird.f32 %v3675_v22 }
 0x28f   : > { %v1523_v24 = vadd.s32 %v1522_v32, %v1518_v44  ;;  %vm1783_vm2 = vcmp.gt.s32.totalorder %v1782_v57, 0  ;;  %v1569_v56 = vand.u32 2139095040, %v4007_v25  ;;  %v1751_v46 = vcvt.s32.f32 %v1744_v48 }
 0x290   : > { %v1748_v29 = vor.u32 4788187, %v1747_v45  ;;  %v1784_v12 = vsel %vm1783_vm2, %v1782_v57, 0  ;;  %v4057_v1 = vand.u32 3, %v1758_v49  ;;  %v4059_v27 = vand.u32 3, %v2608_v7 }
 0x291   : > { %v1524_v30 = vadd.s32 536870912, %v1523_v24  ;;  %v1786_v4 = vand.u32 31, %v1784_v12  ;;  %v1780_v53 = vor.u32 8388608, %v1779_v61  ;;  %v1570_v63 = vshrl.u32 %v1569_v56, 23 }
 0x292   : > { %v1749_v5 = vand.u32 2147483647, %v1748_v29  ;;  %v1785_v23 = vshrl.u32 %v1784_v12, 5  ;;  %v1519_v49 = vadd.s32 %v4014_v26, %v4012_v47  ;;  %vm1767_vm15 = vcmp.eq.s32.totalorder %v4057_v1, 2 }
 0x293   : > { %v4055_v43 = vshrl.u32 %v1524_v30, 30  ;;  %v1787_v6 = vsub.s32 32, %v1786_v4  ;;  %v1789_v18 = vshll.u32 %v3219_v54, %v1786_v4  ;;  %v1792_v36 = vshll.u32 %v3220_v58, %v1786_v4 }
 0x294   : > { %v1752_v52 = vmul.f32 %v1751_v46, %v1749_v5  ;;  %v1795_v34 = vshll.u32 %v3221_v60, %v1786_v4  ;;  %v1798_v40 = vshll.u32 %v3222_v62, %v1786_v4  ;;  %v1801_v50 = vshll.u32 %v3223_v0, %v1786_v4 }
 0x295   : > { %v1526_v10 = vshll.u32 %v4055_v43, 30  ;;  %v1790_v21 = vshrl.u32 %v3220_v58, %v1787_v6  ;;  %v1793_v2 = vshrl.u32 %v3221_v60, %v1787_v6  ;;  %v1796_v31 = vshrl.u32 %v3222_v62, %v1787_v6 }
 0x296   : > { %v1753_v59 = vxor.u32 2147483648, %v1752_v52  ;;  %v1799_v51 = vshrl.u32 %v3223_v0, %v1787_v6  ;;  %v1802_v20 = vshrl.u32 %v3224_v17, %v1787_v6  ;;  %v4083_v16 = vshll.u32 %v1780_v53, 8 }
 0x297   : > { %v4065_v38 = vsub.s32 %v1523_v24, %v1526_v10  ;;  %v1791_v3 = vor.u32 %v1790_v21, %v1789_v18  ;;  %v1794_v39 = vor.u32 %v1793_v2, %v1792_v36  ;;  %v1797_v28 = vor.u32 %v1796_v31, %v1795_v34 }
 0x298   : > { %v1754_v55 = vsel %vm1671_vm3, %v1753_v59, %v1752_v52  ;;  %v1800_v19 = vor.u32 %v1799_v51, %v1798_v40  ;;  %v1803_v44 = vor.u32 %v1802_v20, %v1801_v50  ;;  %v2910_v57 = vadd.s32 4294967169, %v1570_v63 }
 0x299   : > { %v1757_v41 = vsel %vm3999_vm12, %v3675_v22, %v1754_v55  ;;  %v1529_v35 = vsub.s32 0, %v4065_v38  ;;  %vm1465_vm3 = vcmp.lt.s32.totalorder %v3839_v8, 0  ;;  %v1549_v45 = vsub.s32 4, %v4055_v43 }
 0x29a   : > { %3194 = vcosq.f32 %v1757_v41  ;;  %vm1804_vm1 = vcmp.lt.s32.totalorder %v1785_v23, 1  ;;  %vm1807_vm0 = vcmp.lt.s32.totalorder %v1785_v23, 4  ;;  %vm2614_vm4 = vcmp.eq.s32.totalorder %v4059_v27, 2 }
 0x29b   : > { %3196 = vsinq.f32 %v1757_v41  ;;  %v2907_v33 = vmin.u32 %v1529_v35, %v4065_v38  ;;  %v1788_v32 = vshrl.u32 %v3219_v54, %v1787_v6  ;;  %vm1805_vm5 = vcmp.lt.s32.totalorder %v1785_v23, 2 }
 0x29c   : > { %v1809_v47 = vsel %vm1807_vm0, %v1797_v28, 2102212464  ;;  %v1812_v26 = vsel %vm1804_vm1, %v1791_v3, %v1794_v39  ;;  %vm1764_vm6 = vcmp.eq.s32.totalorder %v4057_v1, 0  ;;  %vm2611_vm7 = vcmp.eq.s32.totalorder %v4059_v27, 0 }
 0x29d   : > { %v1531_v48 = vclz %v2907_v33  ;;  %vm1806_vm8 = vcmp.lt.s32.totalorder %v1785_v23, 3  ;;  %v1813_v29 = vsel %vm1807_vm0, %v1800_v19, 920167782  ;;  %v1816_v7 = vsel %vm1804_vm1, %v1794_v39, %v1797_v28 }
 0x29e   : > { %vm1763_vm9 = vcmp.lt.s32.totalorder %v4057_v1, 2  ;;  %vm2610_vm10 = vcmp.lt.s32.totalorder %v4059_v27, 2  ;;  %v1808_v12 = vsel %vm1804_vm1, %v1788_v32, %v1791_v3  ;;  %v1814_v30 = vsel %vm1806_vm8, %v1797_v28, %v1813_v29 }
 0x29f   : > { %v2908_v24 = vadd.s32 4294967294, %v1531_v48  ;;  %v1817_v61 = vsel %vm1807_vm0, %v1803_v44, 1326507024  ;;  %v1576_v4 = vadd.s32 1, %v2910_v57  ;;  %v1810_v56 = vsel %vm1806_vm8, %v1794_v39, %v1809_v47 }
 0x2a0   : > { %v1815_v5 = vsel %vm1805_vm5, %v1812_v26, %v1814_v30  ;;  %v1818_v46 = vsel %vm1806_vm8, %v1800_v19, %v1817_v61  ;;  %v1566_v21 = vand.u32 2147483647, %v4007_v25  ;;  %v1811_v31 = vsel %vm1805_vm5, %v1808_v12, %v1810_v56 }
 0x2a1   : > { %vm2909_vm12 = vcmp.lt.s32.totalorder %v2908_v24, 0  ;;  %v1819_v52 = vsel %vm1805_vm5, %v1816_v7, %v1818_v46  ;;  %v4104_v10 = vmul.u32.u64.low %v4083_v16, %v1815_v5  ;;  %v4105_v53 = vmul.u32.u64.high %v4083_v16, %v1815_v5, %v4104_v10 }
 0x2a2   : > { %v1534_v6 = vsel %vm2909_vm12, 0, %v2908_v24  ;;  %vm1577_vm13 = vcmp.gt.s32.totalorder %v1576_v4, 0  ;;  %v4111_v18 = vmul.u32.u64.low %v4083_v16, %v1819_v52  ;;  %v4112_v51 = vmul.u32.u64.high %v4083_v16, %v1819_v52, %v4111_v18 }
 0x2a3   : > { %v1535_v63 = vsub.s32 32, %v1534_v6  ;;  %v1539_v59 = vsub.s32 4294967266, %v1534_v6  ;;  %v1578_v55 = vsel %vm1577_vm13, %v1576_v4, 0  ;;  %v1536_v20 = vshll.u32 %v4065_v38, %v1534_v6 }
 0x2a4   : > { %v3195_v2 = vpop.eup %3194  ;;  %v1550_v50 = vsel %vm1465_vm3, %v1549_v45, %v4055_v43  ;;  %v1830_v3 = vadd.s32 1, %v4105_v53  ;;  %v1580_v23 = vand.u32 31, %v1578_v55  ;;  %v1827_v44 = vmul.u32 %v4083_v16, %v1811_v31 }
 0x2a5   : > { %v3197_v36 = vpop.eup %3196  ;;  %v1768_v34 = vxor.u32 2147483648, %v3195_v2  ;;  %v1537_v41 = vshrl.u32 %v1519_v49, %v1535_v63  ;;  %v1540_v35 = vadd.s32 127, %v1539_v59  ;;  %vm1829_vm14 = vc.u32 %v4112_v51, %v4104_v10 }
 0x2a6   : > { %v1765_v40 = vxor.u32 2147483648, %v3197_v36  ;;  %v1831_v16 = vsel %vm1829_vm14, %v1830_v3, %v4105_v53  ;;  %v1581_v26 = vsub.s32 32, %v1580_v23  ;;  %vm4143_vm2 = vcmp.le.f32.partialorder %v1463_v37, 0.7853982 }
 0x2a7   : > { %v1769_v39 = vsel %vm1767_vm15, %v1768_v34, %v3197_v36  ;;  %v2616_v28 = vsel %vm2614_vm4, %v1768_v34, %v3197_v36  ;;  %v1538_v33 = vor.u32 %v1537_v41, %v1536_v20  ;;  %v1541_v19 = vshll.u32 %v1540_v35, 23 }
 0x2a8   : > { %v1766_v38 = vsel %vm1764_vm6, %v3195_v2, %v1765_v40  ;;  %v2613_v49 = vsel %vm2611_vm7, %v3195_v2, %v1765_v40  ;;  %v1832_v7 = vadd.s32 %v1831_v16, %v1827_v44  ;;  %v1573_v12 = vand.u32 8388607, %v1566_v21 }
 0x2a9   : > { %v1770_v43 = vsel %vm1763_vm9, %v1766_v38, %v1769_v39  ;;  %v2617_v57 = vsel %vm2610_vm10, %v2613_v49, %v2616_v28  ;;  %v1542_v48 = vor.u32 4788187, %v1541_v19  ;;  %v1545_v45 = vcvt.s32.f32 %v1538_v33 }
 0x2aa   : > { %v1771_v32 = vsel %vm1761_vm11, nan, %v1770_v43  ;;  %v2618_v47 = vsel %vm1761_vm11, nan, %v2617_v57  ;;  %v1833_v30 = vadd.s32 536870912, %v1832_v7  ;;  %v1584_v61 = vshrl.u32 %v3220_v58, %v1581_v26 }
 0x2ab   : > { %v1881_v24 = vmul.f32 %v1771_v32, %v3440_v9  ;;  %v2729_v1 = vmul.f32 %v2618_v47, %v3440_v9  ;;  %v1543_v29 = vand.u32 2147483647, %v1542_v48  ;;  %v1587_v4 = vshrl.u32 %v3221_v60, %v1581_v26 }
 0x2ac   : > { %v1552_v9 = vsel %vm4143_vm2, 0, %v1550_v50  ;;  %v4155_v56 = vshrl.u32 %v1578_v55, 5  ;;  %v1590_v37 = vshrl.u32 %v3222_v62, %v1581_v26  ;;  %v1593_v5 = vshrl.u32 %v3223_v0, %v1581_v26 }
 0x2ad   : > { %1889 = vst [vmem:[%s3763_s15 + $0x30] sm:$0xff] %v1881_v24  ;;  %2737 = vst [vmem:[%s3769_s19 + $0x30] sm:$0xff] %v2729_v1  ;;  %v1546_v22 = vmul.f32 %v1545_v45, %v1543_v29  ;;  %v4159_v6 = vshrl.u32 %v1833_v30, 30  ;;  %v1583_v52 = vshll.u32 %v3219_v54, %v1580_v23  ;;  %v1586_v53 = vshll.u32 %v3220_v58, %v1580_v23 }
 0x2ae   : > { %v1589_v63 = vshll.u32 %v3221_v60, %v1580_v23  ;;  %v1592_v59 = vshll.u32 %v3222_v62, %v1580_v23  ;;  %v1595_v2 = vshll.u32 %v3223_v0, %v1580_v23  ;;  %v1596_v31 = vshrl.u32 %v3224_v17, %v1581_v26 }
 0x2af   : > { %v1547_v46 = vxor.u32 2147483648, %v1546_v22  ;;  %v1835_v55 = vshll.u32 %v4159_v6, 30  ;;  %v1585_v36 = vor.u32 %v1584_v61, %v1583_v52  ;;  %v1588_v34 = vor.u32 %v1587_v4, %v1586_v53 }
 0x2b0   : > { %v1591_v58 = vor.u32 %v1590_v37, %v1589_v63  ;;  %v1594_v41 = vor.u32 %v1593_v5, %v1592_v59  ;;  %v1597_v60 = vor.u32 %v1596_v31, %v1595_v2  ;;  %v2400_v62 = vadd.s32 3, %v1552_v9 }
 0x2b1   : > { %v1548_v18 = vsel %vm1465_vm3, %v1547_v46, %v1546_v22  ;;  %v1836_v35 = vsub.s32 %v1832_v7, %v1835_v55  ;;  %v1574_v0 = vor.u32 8388608, %v1573_v12  ;;  %v1556_v17 = vand.u32 3, %v1552_v9 }
 0x2b2   : > { %v1551_v20 = vsel %vm4143_vm2, %v3839_v8, %v1548_v18  ;;  %vm1598_vm3 = vcmp.lt.s32.totalorder %v4155_v56, 1  ;;  %vm1601_vm1 = vcmp.lt.s32.totalorder %v4155_v56, 4  ;;  %v2401_v28 = vand.u32 3, %v2400_v62 }
 0x2b3   : > { %3198 = vcosq.f32 %v1551_v20  ;;  %v1838_v40 = vsub.s32 0, %v1836_v35  ;;  %v1606_v50 = vsel %vm1598_vm3, %v1585_v36, %v1588_v34  ;;  %v1607_v3 = vsel %vm1601_vm1, %v1594_v41, 920167782 }
 0x2b4   : > { %3200 = vsinq.f32 %v1551_v20  ;;  %v1610_v23 = vsel %vm1598_vm3, %v1588_v34, %v1591_v58  ;;  %v1611_v39 = vsel %vm1601_vm1, %v1597_v60, 1326507024  ;;  %vm1600_vm0 = vcmp.lt.s32.totalorder %v4155_v56, 3 }
 0x2b5   : > { %v2919_v33 = vmin.u32 %v1838_v40, %v1836_v35  ;;  %vm1599_vm15 = vcmp.lt.s32.totalorder %v4155_v56, 2  ;;  %v1608_v19 = vsel %vm1600_vm0, %v1591_v58, %v1607_v3  ;;  %v1612_v38 = vsel %vm1600_vm0, %v1594_v41, %v1611_v39 }
 0x2b6   : > { %v1614_v49 = vshll.u32 %v1574_v0, 8  ;;  %v1603_v43 = vsel %vm1601_vm1, %v1591_v58, 2102212464  ;;  %v1609_v57 = vsel %vm1599_vm15, %v1606_v50, %v1608_v19  ;;  %v1613_v48 = vsel %vm1599_vm15, %v1610_v23, %v1612_v38 }
 0x2b7   : > { %v1840_v44 = vclz %v2919_v33  ;;  %vm1555_vm4 = vweird.f32 %v3839_v8  ;;  %vm1557_vm5 = vcmp.lt.s32.totalorder %v1556_v17, 2  ;;  %v1582_v45 = vshrl.u32 %v3219_v54, %v1581_v26 }
 0x2b8   : > { %vm1558_vm6 = vcmp.eq.s32.totalorder %v1556_v17, 0  ;;  %v4191_v47 = vmul.u32.u64.low %v1614_v49, %v1613_v48  ;;  %v4192_v16 = vmul.u32.u64.high %v1614_v49, %v1613_v48, %v4191_v47  ;;  %v1604_v1 = vsel %vm1600_vm0, %v1588_v34, %v1603_v43 }
 0x2b9   : > { %v2920_v32 = vadd.s32 4294967294, %v1840_v44  ;;  %v1602_v24 = vsel %vm1598_vm3, %v1582_v45, %v1585_v36  ;;  %v4198_v29 = vmul.u32.u64.low %v1614_v49, %v1609_v57  ;;  %v4199_v7 = vmul.u32.u64.high %v1614_v49, %v1609_v57, %v4198_v29 }
 0x2ba   : > { %vm1561_vm7 = vcmp.eq.s32.totalorder %v1556_v17, 2  ;;  %vm2402_vm8 = vcmp.lt.s32.totalorder %v2401_v28, 2  ;;  %vm2403_vm9 = vcmp.eq.s32.totalorder %v2401_v28, 0  ;;  %vm2406_vm11 = vcmp.eq.s32.totalorder %v2401_v28, 2 }
 0x2bb   : > { %vm2921_vm10 = vcmp.lt.s32.totalorder %v2920_v32, 0  ;;  %v1828_v12 = vadd.s32 %v4104_v10, %v4112_v51  ;;  %v1605_v9 = vsel %vm1599_vm15, %v1602_v24, %v1604_v1  ;;  %vm1623_vm12 = vc.u32 %v4192_v16, %v4198_v29 }
 0x2bc   : > { %v1843_v22 = vsel %vm2921_vm10, 0, %v2920_v32  ;;  %v1621_v56 = vmul.u32 %v1614_v49, %v1605_v9  ;;  %v1624_v2 = vadd.s32 1, %v4199_v7  ;;  %v1858_v17 = vsub.s32 4, %v4159_v6 }
 0x2bd   : > { %v3199_v27 = vpop.eup %3198  ;;  %v1844_v61 = vsub.s32 32, %v1843_v22  ;;  %v1848_v4 = vsub.s32 4294967266, %v1843_v22  ;;  %v1845_v46 = vshll.u32 %v1836_v35, %v1843_v22  ;;  %vm1774_vm13 = vcmp.lt.s32.totalorder %v3967_v14, 0 }
 0x2be   : > { %v3201_v54 = vpop.eup %3200  ;;  %v1562_v26 = vxor.u32 2147483648, %v3199_v27  ;;  %v1625_v58 = vsel %vm1623_vm12, %v1624_v2, %v4199_v7  ;;  %v1859_v23 = vsel %vm1774_vm13, %v1858_v17, %v4159_v6  ;;  %vm1773_vm14 = vcmp.le.f32.partialorder %v1772_v42, 0.7853982 }
 0x2bf   : > { %v1559_v30 = vxor.u32 2147483648, %v3201_v54  ;;  %v1846_v63 = vshrl.u32 %v1828_v12, %v1844_v61  ;;  %v1849_v10 = vadd.s32 127, %v1848_v4  ;;  %v1626_v60 = vadd.s32 %v1625_v58, %v1621_v56 }
 0x2c0   : > { %v1563_v37 = vsel %vm1561_vm7, %v1562_v26, %v3201_v54  ;;  %v2408_v5 = vsel %vm2406_vm11, %v1562_v26, %v3201_v54  ;;  %v1861_v33 = vsel %vm1773_vm14, 0, %v1859_v23  ;;  %v1622_v42 = vadd.s32 %v4198_v29, %v4192_v16 }
 0x2c1   : > { %v1560_v52 = vsel %vm1558_vm6, %v3199_v27, %v1559_v30  ;;  %v2405_v53 = vsel %vm2403_vm9, %v3199_v27, %v1559_v30  ;;  %v1847_v55 = vor.u32 %v1846_v63, %v1845_v46  ;;  %v1850_v36 = vshll.u32 %v1849_v10, 23 }
 0x2c2   : > { %v1564_v51 = vsel %vm1557_vm5, %v1560_v52, %v1563_v37  ;;  %v2409_v59 = vsel %vm2402_vm8, %v2405_v53, %v2408_v5  ;;  %v1627_v0 = vadd.s32 536870912, %v1626_v60  ;;  %v2712_v49 = vadd.s32 3, %v1861_v33 }
 0x2c3   : > { %v1565_v31 = vsel %vm1555_vm4, nan, %v1564_v51  ;;  %v2410_v18 = vsel %vm1555_vm4, nan, %v2409_v59  ;;  %v1851_v41 = vor.u32 4788187, %v1850_v36  ;;  %v1854_v35 = vcvt.s32.f32 %v1847_v55 }
 0x2c4   : > { %v1879_v34 = vmul.f32 %v1565_v31, %v3443_v11  ;;  %v2727_v20 = vmul.f32 %v2410_v18, %v3443_v11  ;;  %v1628_v8 = vshrl.u32 %v1627_v0, 30  ;;  %v1865_v43 = vand.u32 3, %v1861_v33 }
 0x2c5   : > { %v1852_v62 = vand.u32 2147483647, %v1851_v41  ;;  %v2713_v48 = vand.u32 3, %v2712_v49  ;;  %vm1864_vm6 = vweird.f32 %v3967_v14  ;;  %vm1568_vm7 = vcmp.lt.s32.totalorder %v4007_v25, 0 }
 0x2c6   : > { %1887 = vst [vmem:[%s3763_s15 + $0x20] sm:$0xff] %v1879_v34  ;;  %2735 = vst [vmem:[%s3769_s19 + $0x20] sm:$0xff] %v2727_v20  ;;  %v1629_v3 = vshll.u32 %v1628_v8, 30  ;;  %vm1866_vm3 = vcmp.lt.s32.totalorder %v1865_v43, 2  ;;  %vm1867_vm1 = vcmp.eq.s32.totalorder %v1865_v43, 0  ;;  %vm1870_vm0 = vcmp.eq.s32.totalorder %v1865_v43, 2 }
 0x2c7   : > { %v1855_v40 = vmul.f32 %v1854_v35, %v1852_v62  ;;  %vm2718_vm15 = vcmp.eq.s32.totalorder %v2713_v48, 2  ;;  %vm2714_vm4 = vcmp.lt.s32.totalorder %v2713_v48, 2  ;;  %vm2715_vm5 = vcmp.eq.s32.totalorder %v2713_v48, 0 }
 0x2c8   : > { %v1630_v39 = vsub.s32 %v1626_v60, %v1629_v3  ;;  %v1652_v59 = vsub.s32 4, %v1628_v8  ;;  %vm1567_vm8 = vcmp.le.f32.partialorder %v1566_v21, 0.7853982 }
 0x2c9   : > { %v1856_v50 = vxor.u32 2147483648, %v1855_v40 }
 0x2ca   : > { %v1632_v19 = vsub.s32 0, %v1630_v39  ;;  %v1653_v2 = vsel %vm1568_vm7, %v1652_v59, %v1628_v8 }
 0x2cb   : > { %v1857_v11 = vsel %vm1774_vm13, %v1856_v50, %v1855_v40  ;;  %v1655_v18 = vsel %vm1567_vm8, 0, %v1653_v2 }
 0x2cc   : > { %v1860_v28 = vsel %vm1773_vm14, %v3967_v14, %v1857_v11  ;;  %v2911_v38 = vmin.u32 %v1632_v19, %v1630_v39  ;;  %v1659_v55 = vand.u32 3, %v1655_v18 }
 0x2cd   : > { %3202 = vcosq.f32 %v1860_v28 }
 0x2ce   : > { %3204 = vsinq.f32 %v1860_v28  ;;  %v1634_v44 = vclz %v2911_v38  ;;  %vm1664_vm9 = vcmp.eq.s32.totalorder %v1659_v55, 2  ;;  %vm1661_vm11 = vcmp.eq.s32.totalorder %v1659_v55, 0 }
 0x2cf   : > { %vm1660_vm13 = vcmp.lt.s32.totalorder %v1659_v55, 2 }
 0x2d0   : > { %v2912_v57 = vadd.s32 4294967294, %v1634_v44 }
 0x2d2   : > { %vm2913_vm2 = vcmp.lt.s32.totalorder %v2912_v57, 0 }
 0x2d3   : > { %v1637_v45 = vsel %vm2913_vm2, 0, %v2912_v57  ;;  %vm1658_vm2 = vweird.f32 %v4007_v25 }
 0x2d4   : > { %v1638_v32 = vsub.s32 32, %v1637_v45  ;;  %v1642_v47 = vsub.s32 4294967266, %v1637_v45  ;;  %v1639_v27 = vshll.u32 %v1630_v39, %v1637_v45 }
 0x2d6   : > { %v1640_v54 = vshrl.u32 %v1622_v42, %v1638_v32  ;;  %v1643_v26 = vadd.s32 127, %v1642_v47 }
 0x2d7   : > { %v3203_v6 = vpop.eup %3202 }
 0x2d8   : > { %v3205_v24 = vpop.eup %3204  ;;  %v1871_v1 = vxor.u32 2147483648, %v3203_v6  ;;  %v1641_v16 = vor.u32 %v1640_v54, %v1639_v27  ;;  %v1644_v29 = vshll.u32 %v1643_v26, 23 }
 0x2d9   : > { %v1868_v7 = vxor.u32 2147483648, %v3205_v24 }
 0x2da   : > { %v1872_v12 = vsel %vm1870_vm0, %v1871_v1, %v3205_v24  ;;  %v2720_v22 = vsel %vm2718_vm15, %v1871_v1, %v3205_v24  ;;  %v1645_v46 = vor.u32 4788187, %v1644_v29  ;;  %v1648_v10 = vcvt.s32.f32 %v1641_v16 }
 0x2db   : > { %v1869_v30 = vsel %vm1867_vm1, %v3203_v6, %v1868_v7  ;;  %v2717_v61 = vsel %vm2715_vm5, %v3203_v6, %v1868_v7 }
 0x2dc   : > { %v1873_v4 = vsel %vm1866_vm3, %v1869_v30, %v1872_v12  ;;  %v2721_v9 = vsel %vm2714_vm4, %v2717_v61, %v2720_v22  ;;  %v1646_v63 = vand.u32 2147483647, %v1645_v46 }
 0x2dd   : > { %v1874_v37 = vsel %vm1864_vm6, nan, %v1873_v4  ;;  %v2722_v5 = vsel %vm1864_vm6, nan, %v2721_v9 }
 0x2de   : > { %v1882_v52 = vmul.f32 %v1874_v37, %v3446_v13  ;;  %v2730_v53 = vmul.f32 %v2722_v5, %v3446_v13  ;;  %v1649_v51 = vmul.f32 %v1648_v10, %v1646_v63  ;;  %v2504_v13 = vadd.s32 3, %v1655_v18 }
 0x2e0   : > { %1890 = vst [vmem:[%s3763_s15 + $0x38] sm:$0xff] %v1882_v52  ;;  %2738 = vst [vmem:[%s3769_s19 + $0x38] sm:$0xff] %v2730_v53  ;;  %v1650_v56 = vxor.u32 2147483648, %v1649_v51  ;;  %v2505_v36 = vand.u32 3, %v2504_v13 }
 0x2e2   : > { %v1651_v14 = vsel %vm1568_vm7, %v1650_v56, %v1649_v51  ;;  %vm2510_vm10 = vcmp.eq.s32.totalorder %v2505_v36, 2  ;;  %vm2507_vm12 = vcmp.eq.s32.totalorder %v2505_v36, 0  ;;  %vm2506_vm14 = vcmp.lt.s32.totalorder %v2505_v36, 2 }
 0x2e3   : > { %v1654_v31 = vsel %vm1567_vm8, %v4007_v25, %v1651_v14 }
 0x2e4   : > { %3206 = vcosq.f32 %v1654_v31 }
 0x2e5   : > { %3208 = vsinq.f32 %v1654_v31 }
 0x2ee   : > { %v3207_v34 = vpop.eup %3206 }
 0x2ef   : > { %v3209_v20 = vpop.eup %3208  ;;  %v1665_v58 = vxor.u32 2147483648, %v3207_v34 }
 0x2f0   : > { %v1662_v41 = vxor.u32 2147483648, %v3209_v20 }
 0x2f1   : > { %v1666_v21 = vsel %vm1664_vm9, %v1665_v58, %v3209_v20  ;;  %v2512_v60 = vsel %vm2510_vm10, %v1665_v58, %v3209_v20 }
 0x2f2   : > { %v1663_v62 = vsel %vm1661_vm11, %v3207_v34, %v1662_v41  ;;  %v2509_v35 = vsel %vm2507_vm12, %v3207_v34, %v1662_v41 }
 0x2f3   : > { %v1667_v0 = vsel %vm1660_vm13, %v1663_v62, %v1666_v21  ;;  %v2513_v17 = vsel %vm2506_vm14, %v2509_v35, %v2512_v60 }
 0x2f4   : > { %v1668_v40 = vsel %vm1658_vm2, nan, %v1667_v0  ;;  %v2514_v8 = vsel %vm1658_vm2, nan, %v2513_v17 }
 0x2f5   : > { %v1880_v50 = vmul.f32 %v1668_v40, %v3449_v15  ;;  %v2728_v3 = vmul.f32 %v2514_v8, %v3449_v15 }
 0x2f7   : > { %1888 = vst [vmem:[%s3763_s15 + $0x28] sm:$0xff] %v1880_v50  ;;  %2736 = vst [vmem:[%s3769_s19 + $0x28] sm:$0xff] %v2728_v3 }
 0x2f8 PF: > { %s22_s17 = sadd.s32 1, %s3217_s17  }
 0x2f9   : > { %p19_p4 = scmp.ge.s32.totalorder %s22_s17, 4  }
 0x2fb   :  { %21 = sbr.rel (!%p19_p4) target bundleno = 1 (0x1), region = 105 }

// kernel: fresadd_forward.3
= control target key start
LH: loop header
LB: loop body
LE: loop exit
PB: predicated region body
PF: predicated region fallthrough
CT: control target
= control target key end

     0   :  { %s1212_s21 = smov 0   ;;  %s1461_s0 = inlined_call_operand.vmem [shape: f32[512,128], index: 0, kind: input, shape index: {}]   ;;  %s1462_s1 = inlined_call_operand.vmem [shape: f32[512,128], index: 1, kind: input, shape index: {}]   ;;  %s1463_s2 = inlined_call_operand.vmem [shape: bf16[128,128], index: 2, kind: input, shape index: {}]   ;;  %s1464_s3 = inlined_call_operand.vmem [shape: f32[1,128], index: 3, kind: input, shape index: {}]   ;;  %s1465_s4 = inlined_call_operand.vmem [shape: bf16[128,128], index: 4, kind: input, shape index: {}]   ;;  %s1466_s5 = inlined_call_operand.vmem [shape: f32[1,128], index: 5, kind: input, shape index: {}]   ;;  %s1467_s6 = inlined_call_operand.vmem [shape: f32[512,128], index: 6, kind: output, shape index: {}]  }
   0x1 LB: > { %s970_s22 = sadd.s32 4294967295, %s1175_s21   ;;  %p974_p0 = scmp.ge.s32.totalorder %s1175_s21, 1  ;;  %s1175_s21 = sphi %s1212_s21, %s16_s21  }
   0x2   : > { %p224_p1 = scmp.lt.s32.totalorder %s1175_s21, 3 }
   0x4   : > { %p225_p2 = pnand %p974_p0, %p224_p1 }
   0x5   : > { %v1153_v0 = vld [vmem:[%s1463_s2] sm:$0xff] (!%p225_p2)   ;;  %s975_s25 = sshll.u32 (!%p225_p2), %s970_s22, 5  ;;  %v1154_v1 = vld [vmem:[%s1463_s2 + $0x8] sm:$0xff] (!%p225_p2)   ;;  %v1155_v2 = vld [vmem:[%s1463_s2 + $0x10] sm:$0xff] (!%p225_p2)  }
   0x6   : > { %228 = sbr.rel (%p225_p2) target bundleno = 534 (0x216), region = 44  ;;  %p260_p3 = scmp.lt.s32.totalorder (!%p225_p2), %s975_s25, 63  ;;  %1049 = vmatprep.subr.bf16.mxu0 (!%p225_p2), %v1153_v0  ;;  %v1156_v3 = vld [vmem:[%s1463_s2 + $0x18] sm:$0xff] (!%p225_p2)   ;;  %v1157_v7 = vld [vmem:[%s1463_s2 + $0x20] sm:$0xff] (!%p225_p2)   ;;  %v1158_v8 = vld [vmem:[%s1463_s2 + $0x28] sm:$0xff] (!%p225_p2)  }
   0x7   : > { %1050 = vmatpush3.bf16.msra.mxu0 (!%p225_p2), %v1153_v0  ;;  %v1159_v9 = vld [vmem:[%s1463_s2 + $0x30] sm:$0xff] (!%p225_p2)   ;;  %v1161_v10 = vld [vmem:[%s1465_s4] sm:$0xff] (!%p225_p2)   ;;  %v1162_v11 = vld [vmem:[%s1465_s4 + $0x8] sm:$0xff] (!%p225_p2)  }
   0x8   : > { %1051 = vmatprep.subr.bf16.mxu0 (!%p225_p2), %v1154_v1  ;;  %1097 = vmatprep.subr.bf16.mxu1 (!%p225_p2), %v1161_v10  ;;  %v1163_v12 = vld [vmem:[%s1465_s4 + $0x10] sm:$0xff] (!%p225_p2)   ;;  %v1160_v13 = vld [vmem:[%s1463_s2 + $0x38] sm:$0xff] (!%p225_p2)   ;;  %v1165_v21 = vld [vmem:[%s1465_s4 + $0x20] sm:$0xff] (!%p225_p2)  }
   0x9   : > { %1098 = vmatpush3.bf16.msra.mxu1 (!%p225_p2), %v1161_v10  ;;  %v1164_v16 = vld [vmem:[%s1465_s4 + $0x18] sm:$0xff] (!%p225_p2)   ;;  %v1166_v24 = vld [vmem:[%s1465_s4 + $0x28] sm:$0xff] (!%p225_p2)   ;;  %v1167_v62 = vld [vmem:[%s1465_s4 + $0x30] sm:$0xff] (!%p225_p2)  }
   0xa   : > { %1099 = vmatprep.subr.bf16.mxu1 (!%p225_p2), %v1162_v11  ;;  %v1168_v63 = vld [vmem:[%s1465_s4 + $0x38] sm:$0xff] (!%p225_p2)   ;;  %v1311_v0 = vld [vmem:[%s1464_s3] ss:$0 sm:$0xff] (!%p225_p2) }
   0xb   : > { %1052 = vmatpush3.bf16.msra.mxu0 (!%p225_p2), %v1154_v1 }
   0xc   : > { %1053 = vmatprep.subr.bf16.mxu0 (!%p225_p2), %v1155_v2 }
   0xd   : > { %s1469_s25 = smov (!%p260_p3, %s975_s25), 63  ;;  %1100 = vmatpush3.bf16.msra.mxu1 %v1162_v11 }
   0xe   : > { %s1229_s30 = sshll.u32 %s1469_s25, 3  ;;  %1101 = vmatprep.subr.bf16.mxu1 %v1163_v12 }
   0xf   : > { %s1235_s9 = scalar_lea.vmem %s1461_s0, %s1229_s30  ;;  %1054 = vmatpush3.bf16.msra.mxu0 %v1155_v2  ;;  %s1317_s18 = scalar_lea.vmem %s1462_s1, %s1229_s30 }
  0x10   : > { %v278_v4 = vld [vmem:[%s1235_s9] sm:$0xff]  ;;  %v279_v5 = vld [vmem:[%s1235_s9 + $0x8] sm:$0xff]  ;;  %1055 = vmatprep.subr.bf16.mxu0 %v1156_v3  ;;  %v280_v14 = vld [vmem:[%s1235_s9 + $0x10] sm:$0xff]  ;;  %s1392_s24 = scalar_lea.vmem %s1467_s6, %s1229_s30 }
  0x11   : > { %v310_v6 = vpack.c.bf16 %v279_v5, %v278_v4  ;;  %v281_v15 = vld [vmem:[%s1235_s9 + $0x18] sm:$0xff]  ;;  %v282_v17 = vld [vmem:[%s1235_s9 + $0x20] sm:$0xff]  ;;  %v283_v18 = vld [vmem:[%s1235_s9 + $0x28] sm:$0xff]  ;;  %1102 = vmatpush3.bf16.msra.mxu1 %v1163_v12 }
  0x12   : > { %v311_v19 = vpack.c.bf16 %v281_v15, %v280_v14  ;;  %v312_v20 = vpack.c.bf16 %v283_v18, %v282_v17  ;;  %1103 = vmatprep.subr.bf16.mxu1 %v1164_v16  ;;  %v284_v22 = vld [vmem:[%s1235_s9 + $0x30] sm:$0xff]  ;;  %v285_v23 = vld [vmem:[%s1235_s9 + $0x38] sm:$0xff]  ;;  %v286_v25 = vld [vmem:[%s1235_s9 + $0x40] sm:$0xff] }
  0x13   : > { %1065 = vmatprep.mubr.bf16.mxu0 %v310_v6  ;;  %1056 = vmatpush3.bf16.msra.mxu0 %v1156_v3  ;;  %v287_v26 = vld [vmem:[%s1235_s9 + $0x48] sm:$0xff]  ;;  %v313_v27 = vpack.c.bf16 %v285_v23, %v284_v22  ;;  %v288_v29 = vld [vmem:[%s1235_s9 + $0x50] sm:$0xff]  ;;  %v289_v30 = vld [vmem:[%s1235_s9 + $0x58] sm:$0xff] }
  0x14   : > { %1057 = vmatprep.subr.bf16.mxu0 %v1157_v7  ;;  %v314_v28 = vpack.c.bf16 %v287_v26, %v286_v25  ;;  %v290_v31 = vld [vmem:[%s1235_s9 + $0x60] sm:$0xff]  ;;  %v291_v32 = vld [vmem:[%s1235_s9 + $0x68] sm:$0xff]  ;;  %v315_v33 = vpack.c.bf16 %v289_v30, %v288_v29  ;;  %v292_v35 = vld [vmem:[%s1235_s9 + $0x70] sm:$0xff] }
  0x15   : > { %1104 = vmatpush3.bf16.msra.mxu1 %v1164_v16  ;;  %v316_v34 = vpack.c.bf16 %v291_v32, %v290_v31  ;;  %v293_v36 = vld [vmem:[%s1235_s9 + $0x78] sm:$0xff]  ;;  %v294_v37 = vld [vmem:[%s1235_s9 + $0x80] sm:$0xff]  ;;  %v295_v38 = vld [vmem:[%s1235_s9 + $0x88] sm:$0xff] }
  0x16   : > { %1105 = vmatprep.subr.bf16.mxu1 %v1165_v21  ;;  %v317_v39 = vpack.c.bf16 %v293_v36, %v292_v35  ;;  %v318_v40 = vpack.c.bf16 %v295_v38, %v294_v37  ;;  %v296_v41 = vld [vmem:[%s1235_s9 + $0x90] sm:$0xff]  ;;  %v297_v42 = vld [vmem:[%s1235_s9 + $0x98] sm:$0xff]  ;;  %v298_v43 = vld [vmem:[%s1235_s9 + $0xa0] sm:$0xff] }
  0x17   : > { %1058 = vmatpush3.bf16.msra.mxu0 %v1157_v7  ;;  %v299_v44 = vld [vmem:[%s1235_s9 + $0xa8] sm:$0xff]  ;;  %v319_v45 = vpack.c.bf16 %v297_v42, %v296_v41  ;;  %v300_v47 = vld [vmem:[%s1235_s9 + $0xb0] sm:$0xff]  ;;  %v301_v48 = vld [vmem:[%s1235_s9 + $0xb8] sm:$0xff] }
  0x18   : > { %1059 = vmatprep.subr.bf16.mxu0 %v1158_v8  ;;  %v320_v46 = vpack.c.bf16 %v299_v44, %v298_v43  ;;  %v302_v49 = vld [vmem:[%s1235_s9 + $0xc0] sm:$0xff]  ;;  %v303_v50 = vld [vmem:[%s1235_s9 + $0xc8] sm:$0xff]  ;;  %v321_v51 = vpack.c.bf16 %v301_v48, %v300_v47  ;;  %v304_v53 = vld [vmem:[%s1235_s9 + $0xd0] sm:$0xff] }
  0x19   : > { %1106 = vmatpush3.bf16.msra.mxu1 %v1165_v21  ;;  %v322_v52 = vpack.c.bf16 %v303_v50, %v302_v49  ;;  %v305_v54 = vld [vmem:[%s1235_s9 + $0xd8] sm:$0xff]  ;;  %v306_v55 = vld [vmem:[%s1235_s9 + $0xe0] sm:$0xff]  ;;  %v307_v56 = vld [vmem:[%s1235_s9 + $0xe8] sm:$0xff] }
  0x1a   : > { %1107 = vmatprep.subr.bf16.mxu1 %v1166_v24  ;;  %v323_v57 = vpack.c.bf16 %v305_v54, %v304_v53  ;;  %v324_v58 = vpack.c.bf16 %v307_v56, %v306_v55  ;;  %v308_v59 = vld [vmem:[%s1235_s9 + $0xf0] sm:$0xff]  ;;  %v309_v60 = vld [vmem:[%s1235_s9 + $0xf8] sm:$0xff]  ;;  %v558_v10 = vld [vmem:[%s1317_s18] sm:$0xff] }
  0x1b   : > { %1060 = vmatpush3.bf16.msra.mxu0 %v1158_v8  ;;  %v325_v61 = vpack.c.bf16 %v309_v60, %v308_v59  ;;  %v560_v4 = vld [vmem:[%s1317_s18 + $0x10] sm:$0xff]  ;;  %v561_v7 = vld [vmem:[%s1317_s18 + $0x18] sm:$0xff]  ;;  %v559_v11 = vld [vmem:[%s1317_s18 + $0x8] sm:$0xff] }
  0x1c   : > { %1061 = vmatprep.subr.bf16.mxu0 %v1159_v9  ;;  %v564_v22 = vld [vmem:[%s1317_s18 + $0x30] sm:$0xff]  ;;  %v565_v25 = vld [vmem:[%s1317_s18 + $0x38] sm:$0xff]  ;;  %v562_v26 = vld [vmem:[%s1317_s18 + $0x20] sm:$0xff] }
  0x1d   : > { %1108 = vmatpush3.bf16.msra.mxu1 %v1166_v24  ;;  %v563_v29 = vld [vmem:[%s1317_s18 + $0x28] sm:$0xff]  ;;  %v569_v43 = vld [vmem:[%s1317_s18 + $0x58] sm:$0xff]  ;;  %v566_v44 = vld [vmem:[%s1317_s18 + $0x40] sm:$0xff] }
  0x1e   : > { %1109 = vmatprep.subr.bf16.mxu1 %v1167_v62  ;;  %v567_v47 = vld [vmem:[%s1317_s18 + $0x48] sm:$0xff] }
  0x1f   : > { %1062 = vmatpush3.bf16.msra.mxu0 %v1159_v9 }
  0x20   : > { %1063 = vmatprep.subr.bf16.mxu0 %v1160_v13 }
  0x21   : > { %1110 = vmatpush3.bf16.msra.mxu1 %v1167_v62  ;;  %v570_v62 = vld [vmem:[%s1317_s18 + $0x60] sm:$0xff] }
  0x22   : > { %1111 = vmatprep.subr.bf16.mxu1 %v1168_v63 }
  0x23   : > { %1064 = vmatpush3.bf16.msra.mxu0 %v1160_v13 }
  0x25   : > { %1112 = vmatpush3.bf16.msra.mxu1 %v1168_v63 }
  0x26   : > { %1066 = vmatmul.mubr.bf16.vlgmr.msra.gmra.mrb[0].mxu0 %v311_v19 }
  0x27   : > { %1069 = vmatprep.mubr.bf16.mxu0 %v312_v20 }
  0x2e   : > { %1070 = vmatmul.mubr.bf16.gmra.mrb[4].mxu0 %v313_v27 }
  0x2f   : > { %1073 = vmatprep.mubr.bf16.mxu0 %v314_v28 }
  0x36   : > { %1074 = vmatmul.mubr.bf16.gmra.mrb[8].mxu0 %v315_v33 }
  0x37   : > { %1077 = vmatprep.mubr.bf16.mxu0 %v316_v34 }
  0x3e   : > { %1078 = vmatmul.mubr.bf16.gmra.mrb[12].mxu0 %v317_v39 }
  0x3f   : > { %1081 = vmatprep.mubr.bf16.mxu0 %v318_v40  ;;  %v568_v40 = vld [vmem:[%s1317_s18 + $0x50] sm:$0xff] }
  0x46   : > { %1082 = vmatmul.mubr.bf16.gmra.mrb[16].mxu0 %v319_v45 }
  0x47   : > { %1085 = vmatprep.mubr.bf16.mxu0 %v320_v46 }
  0x4e   : > { %1086 = vmatmul.mubr.bf16.gmra.mrb[20].mxu0 %v321_v51 }
  0x4f   : > { %1089 = vmatprep.mubr.bf16.mxu0 %v322_v52 }
  0x56   : > { %1090 = vmatmul.mubr.bf16.gmra.mrb[24].mxu0 %v323_v57 }
  0x57   : > { %1093 = vmatprep.mubr.bf16.mxu0 %v324_v58  ;;  %v572_v58 = vld [vmem:[%s1317_s18 + $0x70] sm:$0xff] }
  0x5e   : > { %1094 = vmatmul.mubr.bf16.gmra.mrb[28].mxu0 %v325_v61  ;;  %v573_v61 = vld [vmem:[%s1317_s18 + $0x78] sm:$0xff] }
  0xf9   : > { %v1067_v1 = vpop.f32.mrb[0].mxu0 }
  0xfa   : > { %v440_v2 = vadd.f32 %v1067_v1, %v1311_v0  ;;  %v431_v3 = vpop.f32.mrb[1].mxu0 }
  0xfb   : > { %v432_v5 = vadd.f32 %v1311_v0, %v431_v3  ;;  %v1068_v6 = vpop.f32.mrb[2].mxu0 }
  0xfc   : > { %v443_v8 = vadd.f32 %v1068_v6, %v1311_v0  ;;  %v434_v9 = vpop.f32.mrb[3].mxu0  ;;  %v592_v13 = vadd.f32 %v560_v4, %v440_v2  ;;  %v571_v2 = vld [vmem:[%s1317_s18 + $0x68] sm:$0xff] }
  0xfd   : > { %v435_v12 = vadd.f32 %v1311_v0, %v434_v9  ;;  %v590_v15 = vadd.f32 %v558_v10, %v432_v5 }
  0xfe   : > { %v593_v14 = vadd.f32 %v561_v7, %v443_v8 }
  0xff   : > { %v591_v16 = vadd.f32 %v559_v11, %v435_v12 }
 0x100   : > { %v623_v17 = vpack.c.bf16 %v593_v14, %v592_v13  ;;  %v576_v13 = vld [vmem:[%s1317_s18 + $0x90] sm:$0xff] }
 0x101   : > { %v1071_v18 = vpop.f32.mrb[4].mxu0  ;;  %v622_v19 = vpack.c.bf16 %v591_v16, %v590_v15  ;;  %v577_v16 = vld [vmem:[%s1317_s18 + $0x98] sm:$0xff] }
 0x102   : > { %v456_v20 = vadd.f32 %v1071_v18, %v1311_v0  ;;  %v447_v21 = vpop.f32.mrb[5].mxu0 }
 0x103   : > { %v448_v23 = vadd.f32 %v1311_v0, %v447_v21  ;;  %v1072_v24 = vpop.f32.mrb[6].mxu0  ;;  %1113 = vmatprep.mubr.bf16.mxu1 %v622_v19 }
 0x104   : > { %v459_v27 = vadd.f32 %v1072_v24, %v1311_v0  ;;  %v450_v28 = vpop.f32.mrb[7].mxu0  ;;  %1114 = vmatmul.mubr.bf16.vlgmr.msra.gmra.mrb[0].mxu1 %v623_v17  ;;  %v596_v31 = vadd.f32 %v564_v22, %v456_v20  ;;  %v574_v17 = vld [vmem:[%s1317_s18 + $0x80] sm:$0xff]  ;;  %v575_v20 = vld [vmem:[%s1317_s18 + $0x88] sm:$0xff] }
 0x105   : > { %v451_v30 = vadd.f32 %v1311_v0, %v450_v28  ;;  %v594_v33 = vadd.f32 %v562_v26, %v448_v23 }
 0x106   : > { %v597_v32 = vadd.f32 %v565_v25, %v459_v27 }
 0x107   : > { %v595_v34 = vadd.f32 %v563_v29, %v451_v30 }
 0x108   : > { %v625_v35 = vpack.c.bf16 %v597_v32, %v596_v31  ;;  %v580_v31 = vld [vmem:[%s1317_s18 + $0xb0] sm:$0xff] }
 0x109   : > { %v1075_v36 = vpop.f32.mrb[8].mxu0  ;;  %v624_v37 = vpack.c.bf16 %v595_v34, %v594_v33  ;;  %v581_v34 = vld [vmem:[%s1317_s18 + $0xb8] sm:$0xff] }
 0x10a   : > { %v472_v38 = vadd.f32 %v1075_v36, %v1311_v0  ;;  %v463_v39 = vpop.f32.mrb[9].mxu0 }
 0x10b   : > { %v464_v41 = vadd.f32 %v1311_v0, %v463_v39  ;;  %v1076_v42 = vpop.f32.mrb[10].mxu0  ;;  %1117 = vmatprep.mubr.bf16.mxu1 %v624_v37 }
 0x10c   : > { %v475_v45 = vadd.f32 %v1076_v42, %v1311_v0  ;;  %v466_v46 = vpop.f32.mrb[11].mxu0  ;;  %1118 = vmatmul.mubr.bf16.gmra.mrb[4].mxu1 %v625_v35  ;;  %v600_v49 = vadd.f32 %v568_v40, %v472_v38  ;;  %v578_v35 = vld [vmem:[%s1317_s18 + $0xa0] sm:$0xff]  ;;  %v579_v38 = vld [vmem:[%s1317_s18 + $0xa8] sm:$0xff] }
 0x10d   : > { %v467_v48 = vadd.f32 %v1311_v0, %v466_v46  ;;  %v598_v51 = vadd.f32 %v566_v44, %v464_v41 }
 0x10e   : > { %v601_v50 = vadd.f32 %v569_v43, %v475_v45 }
 0x10f   : > { %v599_v52 = vadd.f32 %v567_v47, %v467_v48 }
 0x110   : > { %v627_v53 = vpack.c.bf16 %v601_v50, %v600_v49  ;;  %v584_v49 = vld [vmem:[%s1317_s18 + $0xd0] sm:$0xff] }
 0x111   : > { %v1079_v54 = vpop.f32.mrb[12].mxu0  ;;  %v626_v55 = vpack.c.bf16 %v599_v52, %v598_v51  ;;  %v585_v52 = vld [vmem:[%s1317_s18 + $0xd8] sm:$0xff] }
 0x112   : > { %v488_v56 = vadd.f32 %v1079_v54, %v1311_v0  ;;  %v479_v57 = vpop.f32.mrb[13].mxu0 }
 0x113   : > { %v480_v59 = vadd.f32 %v1311_v0, %v479_v57  ;;  %v1080_v60 = vpop.f32.mrb[14].mxu0  ;;  %1121 = vmatprep.mubr.bf16.mxu1 %v626_v55 }
 0x114   : > { %v491_v63 = vadd.f32 %v1080_v60, %v1311_v0  ;;  %v482_v1 = vpop.f32.mrb[15].mxu0  ;;  %1122 = vmatmul.mubr.bf16.gmra.mrb[8].mxu1 %v627_v53  ;;  %v604_v4 = vadd.f32 %v572_v58, %v488_v56  ;;  %v582_v53 = vld [vmem:[%s1317_s18 + $0xc0] sm:$0xff]  ;;  %v583_v56 = vld [vmem:[%s1317_s18 + $0xc8] sm:$0xff] }
 0x115   : > { %v483_v3 = vadd.f32 %v1311_v0, %v482_v1  ;;  %v602_v6 = vadd.f32 %v570_v62, %v480_v59 }
 0x116   : > { %v605_v5 = vadd.f32 %v573_v61, %v491_v63 }
 0x117   : > { %v603_v7 = vadd.f32 %v571_v2, %v483_v3 }
 0x118   : > { %v629_v8 = vpack.c.bf16 %v605_v5, %v604_v4  ;;  %v588_v4 = vld [vmem:[%s1317_s18 + $0xf0] sm:$0xff] }
 0x119   : > { %v1083_v9 = vpop.f32.mrb[16].mxu0  ;;  %v628_v10 = vpack.c.bf16 %v603_v7, %v602_v6  ;;  %v589_v7 = vld [vmem:[%s1317_s18 + $0xf8] sm:$0xff] }
 0x11a   : > { %v504_v11 = vadd.f32 %v1083_v9, %v1311_v0  ;;  %v495_v12 = vpop.f32.mrb[17].mxu0 }
 0x11b   : > { %v496_v14 = vadd.f32 %v1311_v0, %v495_v12  ;;  %v1084_v15 = vpop.f32.mrb[18].mxu0  ;;  %1125 = vmatprep.mubr.bf16.mxu1 %v628_v10 }
 0x11c   : > { %v507_v18 = vadd.f32 %v1084_v15, %v1311_v0  ;;  %v498_v19 = vpop.f32.mrb[19].mxu0  ;;  %1126 = vmatmul.mubr.bf16.gmra.mrb[12].mxu1 %v629_v8  ;;  %v608_v22 = vadd.f32 %v576_v13, %v504_v11  ;;  %v586_v8 = vld [vmem:[%s1317_s18 + $0xe0] sm:$0xff]  ;;  %v587_v11 = vld [vmem:[%s1317_s18 + $0xe8] sm:$0xff] }
 0x11d   : > { %v499_v21 = vadd.f32 %v1311_v0, %v498_v19  ;;  %v606_v24 = vadd.f32 %v574_v17, %v496_v14  ;;  %v1386_v19 = vld [vmem:[%s1466_s5] ss:$0 sm:$0xff] }
 0x11e   : > { %v609_v23 = vadd.f32 %v577_v16, %v507_v18 }
 0x11f   : > { %v607_v25 = vadd.f32 %v575_v20, %v499_v21 }
 0x120   : > { %v631_v26 = vpack.c.bf16 %v609_v23, %v608_v22 }
 0x121   : > { %v1087_v27 = vpop.f32.mrb[20].mxu0  ;;  %v630_v28 = vpack.c.bf16 %v607_v25, %v606_v24 }
 0x122   : > { %v520_v29 = vadd.f32 %v1087_v27, %v1311_v0  ;;  %v511_v30 = vpop.f32.mrb[21].mxu0 }
 0x123   : > { %v512_v32 = vadd.f32 %v1311_v0, %v511_v30  ;;  %v1088_v33 = vpop.f32.mrb[22].mxu0  ;;  %1129 = vmatprep.mubr.bf16.mxu1 %v630_v28 }
 0x124   : > { %v523_v36 = vadd.f32 %v1088_v33, %v1311_v0  ;;  %v514_v37 = vpop.f32.mrb[23].mxu0  ;;  %1130 = vmatmul.mubr.bf16.gmra.mrb[16].mxu1 %v631_v26  ;;  %v612_v40 = vadd.f32 %v580_v31, %v520_v29 }
 0x125   : > { %v515_v39 = vadd.f32 %v1311_v0, %v514_v37  ;;  %v610_v42 = vadd.f32 %v578_v35, %v512_v32 }
 0x126   : > { %v613_v41 = vadd.f32 %v581_v34, %v523_v36 }
 0x127   : > { %v611_v43 = vadd.f32 %v579_v38, %v515_v39 }
 0x128   : > { %v633_v44 = vpack.c.bf16 %v613_v41, %v612_v40 }
 0x129   : > { %v1091_v45 = vpop.f32.mrb[24].mxu0  ;;  %v632_v46 = vpack.c.bf16 %v611_v43, %v610_v42 }
 0x12a   : > { %v536_v47 = vadd.f32 %v1091_v45, %v1311_v0  ;;  %v527_v48 = vpop.f32.mrb[25].mxu0 }
 0x12b   : > { %v528_v50 = vadd.f32 %v1311_v0, %v527_v48  ;;  %v1092_v51 = vpop.f32.mrb[26].mxu0  ;;  %1133 = vmatprep.mubr.bf16.mxu1 %v632_v46 }
 0x12c   : > { %v539_v54 = vadd.f32 %v1092_v51, %v1311_v0  ;;  %v530_v55 = vpop.f32.mrb[27].mxu0  ;;  %1134 = vmatmul.mubr.bf16.gmra.mrb[20].mxu1 %v633_v44  ;;  %v616_v58 = vadd.f32 %v584_v49, %v536_v47 }
 0x12d   : > { %v531_v57 = vadd.f32 %v1311_v0, %v530_v55  ;;  %v614_v60 = vadd.f32 %v582_v53, %v528_v50 }
 0x12e   : > { %v617_v59 = vadd.f32 %v585_v52, %v539_v54 }
 0x12f   : > { %v615_v61 = vadd.f32 %v583_v56, %v531_v57 }
 0x130   : > { %v635_v62 = vpack.c.bf16 %v617_v59, %v616_v58 }
 0x131   : > { %v1095_v63 = vpop.f32.mrb[28].mxu0  ;;  %v634_v1 = vpack.c.bf16 %v615_v61, %v614_v60 }
 0x132   : > { %v552_v2 = vadd.f32 %v1095_v63, %v1311_v0  ;;  %v543_v3 = vpop.f32.mrb[29].mxu0 }
 0x133   : > { %v544_v5 = vadd.f32 %v1311_v0, %v543_v3  ;;  %v1096_v6 = vpop.f32.mrb[30].mxu0  ;;  %1137 = vmatprep.mubr.bf16.mxu1 %v634_v1 }
 0x134   : > { %v555_v9 = vadd.f32 %v1096_v6, %v1311_v0  ;;  %v546_v10 = vpop.f32.mrb[31].mxu0  ;;  %1138 = vmatmul.mubr.bf16.gmra.mrb[24].mxu1 %v635_v62  ;;  %v620_v13 = vadd.f32 %v588_v4, %v552_v2 }
 0x135   : > { %v547_v12 = vadd.f32 %v1311_v0, %v546_v10  ;;  %v618_v15 = vadd.f32 %v586_v8, %v544_v5 }
 0x136   : > { %v621_v14 = vadd.f32 %v589_v7, %v555_v9 }
 0x137   : > { %v619_v16 = vadd.f32 %v587_v11, %v547_v12 }
 0x138   : > { %v637_v17 = vpack.c.bf16 %v621_v14, %v620_v13 }
 0x139   : > { %v636_v18 = vpack.c.bf16 %v619_v16, %v618_v15 }
 0x13b   : > { %1141 = vmatprep.mubr.bf16.mxu1 %v636_v18 }
 0x13c   : > { %1142 = vmatmul.mubr.bf16.gmra.mrb[28].mxu1 %v637_v17 }
 0x1d7   : > { %v1115_v0 = vpop.f32.mrb[0].mxu1 }
 0x1d8   : > { %v752_v20 = vadd.f32 %v1115_v0, %v1386_v19  ;;  %v743_v21 = vpop.f32.mrb[1].mxu1 }
 0x1d9   : > { %v744_v22 = vadd.f32 %v1386_v19, %v743_v21  ;;  %v1116_v23 = vpop.f32.mrb[2].mxu1 }
 0x1da   : > { %872 = vst [vmem:[%s1392_s24 + $0x10] sm:$0xff] %v752_v20  ;;  %v755_v24 = vadd.f32 %v1116_v23, %v1386_v19  ;;  %v746_v25 = vpop.f32.mrb[3].mxu1 }
 0x1db   : > { %870 = vst [vmem:[%s1392_s24] sm:$0xff] %v744_v22  ;;  %v747_v26 = vadd.f32 %v1386_v19, %v746_v25 }
 0x1dc   : > { %873 = vst [vmem:[%s1392_s24 + $0x18] sm:$0xff] %v755_v24 }
 0x1dd   : > { %871 = vst [vmem:[%s1392_s24 + $0x8] sm:$0xff] %v747_v26 }
 0x1df   : > { %v1119_v27 = vpop.f32.mrb[4].mxu1 }
 0x1e0   : > { %v768_v28 = vadd.f32 %v1119_v27, %v1386_v19  ;;  %v759_v29 = vpop.f32.mrb[5].mxu1 }
 0x1e1   : > { %v760_v30 = vadd.f32 %v1386_v19, %v759_v29  ;;  %v1120_v31 = vpop.f32.mrb[6].mxu1 }
 0x1e2   : > { %876 = vst [vmem:[%s1392_s24 + $0x30] sm:$0xff] %v768_v28  ;;  %v771_v32 = vadd.f32 %v1120_v31, %v1386_v19  ;;  %v762_v33 = vpop.f32.mrb[7].mxu1 }
 0x1e3   : > { %874 = vst [vmem:[%s1392_s24 + $0x20] sm:$0xff] %v760_v30  ;;  %v763_v34 = vadd.f32 %v1386_v19, %v762_v33 }
 0x1e4   : > { %877 = vst [vmem:[%s1392_s24 + $0x38] sm:$0xff] %v771_v32 }
 0x1e5   : > { %875 = vst [vmem:[%s1392_s24 + $0x28] sm:$0xff] %v763_v34 }
 0x1e7   : > { %v1123_v35 = vpop.f32.mrb[8].mxu1 }
 0x1e8   : > { %v784_v36 = vadd.f32 %v1123_v35, %v1386_v19  ;;  %v775_v37 = vpop.f32.mrb[9].mxu1 }
 0x1e9   : > { %v776_v38 = vadd.f32 %v1386_v19, %v775_v37  ;;  %v1124_v39 = vpop.f32.mrb[10].mxu1 }
 0x1ea   : > { %880 = vst [vmem:[%s1392_s24 + $0x50] sm:$0xff] %v784_v36  ;;  %v787_v40 = vadd.f32 %v1124_v39, %v1386_v19  ;;  %v778_v41 = vpop.f32.mrb[11].mxu1 }
 0x1eb   : > { %878 = vst [vmem:[%s1392_s24 + $0x40] sm:$0xff] %v776_v38  ;;  %v779_v42 = vadd.f32 %v1386_v19, %v778_v41 }
 0x1ec   : > { %881 = vst [vmem:[%s1392_s24 + $0x58] sm:$0xff] %v787_v40 }
 0x1ed   : > { %879 = vst [vmem:[%s1392_s24 + $0x48] sm:$0xff] %v779_v42 }
 0x1ef   : > { %v1127_v43 = vpop.f32.mrb[12].mxu1 }
 0x1f0   : > { %v800_v44 = vadd.f32 %v1127_v43, %v1386_v19  ;;  %v791_v45 = vpop.f32.mrb[13].mxu1 }
 0x1f1   : > { %v792_v46 = vadd.f32 %v1386_v19, %v791_v45  ;;  %v1128_v47 = vpop.f32.mrb[14].mxu1 }
 0x1f2   : > { %884 = vst [vmem:[%s1392_s24 + $0x70] sm:$0xff] %v800_v44  ;;  %v803_v48 = vadd.f32 %v1128_v47, %v1386_v19  ;;  %v794_v49 = vpop.f32.mrb[15].mxu1 }
 0x1f3   : > { %882 = vst [vmem:[%s1392_s24 + $0x60] sm:$0xff] %v792_v46  ;;  %v795_v50 = vadd.f32 %v1386_v19, %v794_v49 }
 0x1f4   : > { %885 = vst [vmem:[%s1392_s24 + $0x78] sm:$0xff] %v803_v48 }
 0x1f5   : > { %883 = vst [vmem:[%s1392_s24 + $0x68] sm:$0xff] %v795_v50 }
 0x1f7   : > { %v1131_v51 = vpop.f32.mrb[16].mxu1 }
 0x1f8   : > { %v816_v52 = vadd.f32 %v1131_v51, %v1386_v19  ;;  %v807_v53 = vpop.f32.mrb[17].mxu1 }
 0x1f9   : > { %v808_v54 = vadd.f32 %v1386_v19, %v807_v53  ;;  %v1132_v55 = vpop.f32.mrb[18].mxu1 }
 0x1fa   : > { %888 = vst [vmem:[%s1392_s24 + $0x90] sm:$0xff] %v816_v52  ;;  %v819_v56 = vadd.f32 %v1132_v55, %v1386_v19  ;;  %v810_v57 = vpop.f32.mrb[19].mxu1 }
 0x1fb   : > { %886 = vst [vmem:[%s1392_s24 + $0x80] sm:$0xff] %v808_v54  ;;  %v811_v58 = vadd.f32 %v1386_v19, %v810_v57 }
 0x1fc   : > { %889 = vst [vmem:[%s1392_s24 + $0x98] sm:$0xff] %v819_v56 }
 0x1fd   : > { %887 = vst [vmem:[%s1392_s24 + $0x88] sm:$0xff] %v811_v58 }
 0x1ff   : > { %v1135_v59 = vpop.f32.mrb[20].mxu1 }
 0x200   : > { %v832_v60 = vadd.f32 %v1135_v59, %v1386_v19  ;;  %v823_v61 = vpop.f32.mrb[21].mxu1 }
 0x201   : > { %v824_v62 = vadd.f32 %v1386_v19, %v823_v61  ;;  %v1136_v63 = vpop.f32.mrb[22].mxu1 }
 0x202   : > { %892 = vst [vmem:[%s1392_s24 + $0xb0] sm:$0xff] %v832_v60  ;;  %v835_v1 = vadd.f32 %v1136_v63, %v1386_v19  ;;  %v826_v2 = vpop.f32.mrb[23].mxu1 }
 0x203   : > { %890 = vst [vmem:[%s1392_s24 + $0xa0] sm:$0xff] %v824_v62  ;;  %v827_v3 = vadd.f32 %v1386_v19, %v826_v2 }
 0x204   : > { %893 = vst [vmem:[%s1392_s24 + $0xb8] sm:$0xff] %v835_v1 }
 0x205   : > { %891 = vst [vmem:[%s1392_s24 + $0xa8] sm:$0xff] %v827_v3 }
 0x207   : > { %v1139_v4 = vpop.f32.mrb[24].mxu1 }
 0x208   : > { %v848_v5 = vadd.f32 %v1139_v4, %v1386_v19  ;;  %v839_v6 = vpop.f32.mrb[25].mxu1 }
 0x209   : > { %v840_v7 = vadd.f32 %v1386_v19, %v839_v6  ;;  %v1140_v8 = vpop.f32.mrb[26].mxu1 }
 0x20a   : > { %896 = vst [vmem:[%s1392_s24 + $0xd0] sm:$0xff] %v848_v5  ;;  %v851_v9 = vadd.f32 %v1140_v8, %v1386_v19  ;;  %v842_v10 = vpop.f32.mrb[27].mxu1 }
 0x20b   : > { %894 = vst [vmem:[%s1392_s24 + $0xc0] sm:$0xff] %v840_v7  ;;  %v843_v11 = vadd.f32 %v1386_v19, %v842_v10 }
 0x20c   : > { %897 = vst [vmem:[%s1392_s24 + $0xd8] sm:$0xff] %v851_v9 }
 0x20d   : > { %895 = vst [vmem:[%s1392_s24 + $0xc8] sm:$0xff] %v843_v11 }
 0x20f   : > { %v1143_v12 = vpop.f32.mrb[28].mxu1 }
 0x210   : > { %v864_v13 = vadd.f32 %v1143_v12, %v1386_v19  ;;  %v855_v14 = vpop.f32.mrb[29].mxu1 }
 0x211   : > { %v856_v15 = vadd.f32 %v1386_v19, %v855_v14  ;;  %v1144_v16 = vpop.f32.mrb[30].mxu1 }
 0x212   : > { %900 = vst [vmem:[%s1392_s24 + $0xf0] sm:$0xff] %v864_v13  ;;  %v867_v17 = vadd.f32 %v1144_v16, %v1386_v19  ;;  %v858_v18 = vpop.f32.mrb[31].mxu1 }
 0x213   : > { %898 = vst [vmem:[%s1392_s24 + $0xe0] sm:$0xff] %v856_v15  ;;  %v859_v0 = vadd.f32 %v1386_v19, %v858_v18 }
 0x214   : > { %901 = vst [vmem:[%s1392_s24 + $0xf8] sm:$0xff] %v867_v17 }
 0x215   : > { %899 = vst [vmem:[%s1392_s24 + $0xe8] sm:$0xff] %v859_v0 }
 0x216 PF: > { %s16_s21 = sadd.s32 1, %s1175_s21  }
 0x217   : > { %p13_p4 = scmp.ge.s32.totalorder %s16_s21, 4  }
 0x219   :  { %15 = sbr.rel (!%p13_p4) target bundleno = 1 (0x1), region = 77 }

</bundles_post_ra>
